<compile_context>
chip_gen: v7x
topology: tpu7x:2x2x1
jax: 0.10.0
libtpu: 0.0.40
codegen_flags: <defaults>
</compile_context>

<pallas_src>
import functools

import jax
import jax.numpy as jnp
from jax.experimental import pallas as pl
from jax.experimental.pallas import tpu as pltpu


def _round_up(x, m):
    return ((x + m - 1) // m) * m


_VMEM_LIMIT = 32 * 1024 * 1024  # safe on v5e/v6e/v7x; tiles below are << this


# --------------------------------------------------------------------------
# Kernel A: fused (optional) LayerNorm + input projection for one GSN layer.
# Computes, for a row tile of the flattened (T*B, F) activations:
#   x' = LN(x)            (layer 0 only; eps=1e-5, biased variance like torch)
#   gs = x' @ W_ih_sigma + b_sigma      (b_* = (b_ih + b_hh) halves, pre-summed)
#   gu = x' @ W_ih_u     + b_u
# --------------------------------------------------------------------------
def _gates_in_kernel(x_ref, g_ref, b_ref, ws_ref, wu_ref, bs_ref, bu_ref,
                     os_ref, ou_ref, *, apply_ln):
    x = x_ref[...].astype(jnp.float32)                        # (rt, F)
    if apply_ln:
        mean = jnp.mean(x, axis=-1, keepdims=True)
        var = jnp.mean((x - mean) ** 2, axis=-1, keepdims=True)
        x = (x - mean) * jax.lax.rsqrt(var + 1e-5)
        x = x * g_ref[...] + b_ref[...]
    os_ref[...] = (jnp.dot(x, ws_ref[...], preferred_element_type=jnp.float32)
                   + bs_ref[...]).astype(os_ref.dtype)
    ou_ref[...] = (jnp.dot(x, wu_ref[...], preferred_element_type=jnp.float32)
                   + bu_ref[...]).astype(ou_ref.dtype)


def gates_in(x_tbf, gamma, beta, w_s, w_u, b_s, b_u, *, apply_ln,
             row_tile=512):
    T, B, F = x_tbf.shape
    H = w_s.shape[1]
    M = T * B
    x2d = x_tbf.reshape(M, F)
    rt = min(row_tile, _round_up(M, 8))
    Mp = _round_up(M, rt)
    if Mp != M:
        x2d = jnp.pad(x2d, ((0, Mp - M), (0, 0)))

    kernel = functools.partial(_gates_in_kernel, apply_ln=apply_ln)
    gs, gu = pl.pallas_call(
        kernel,
        out_shape=(jax.ShapeDtypeStruct((Mp, H), jnp.float32),
                   jax.ShapeDtypeStruct((Mp, H), jnp.float32)),
        grid_spec=pltpu.PrefetchScalarGridSpec(
            num_scalar_prefetch=0,
            grid=(Mp // rt,),
            in_specs=[
                pl.BlockSpec((rt, F), lambda i: (i, 0)),
                pl.BlockSpec((1, F), lambda i: (0, 0)),    # gamma
                pl.BlockSpec((1, F), lambda i: (0, 0)),    # beta
                pl.BlockSpec((F, H), lambda i: (0, 0)),    # W_ih sigma-half
                pl.BlockSpec((F, H), lambda i: (0, 0)),    # W_ih u-half
                pl.BlockSpec((1, H), lambda i: (0, 0)),    # bias sigma-half
                pl.BlockSpec((1, H), lambda i: (0, 0)),    # bias u-half
            ],
            out_specs=(pl.BlockSpec((rt, H), lambda i: (i, 0)),
                       pl.BlockSpec((rt, H), lambda i: (i, 0))),
        ),
        compiler_params=pltpu.CompilerParams(
            dimension_semantics=("parallel",),
            vmem_limit_bytes=_VMEM_LIMIT),
    )(x2d, gamma.reshape(1, F), beta.reshape(1, F), w_s, w_u,
      b_s.reshape(1, H), b_u.reshape(1, H))

    gs = gs[:M].reshape(T, B, H)
    gu = gu[:M].reshape(T, B, H)
    return gs, gu


# --------------------------------------------------------------------------
# Kernel B: GSN recurrence over time, T_CHUNK timesteps per grid iteration.
# Per step only: g = gates_in[t] + h @ W_hh (two lane-aligned (.,H) dots),
# then sigmoid decay gate, leaky membrane integration, Heaviside spike.
# h / c live in VMEM scratch carried across grid steps (sequential axis).
# --------------------------------------------------------------------------
def _gsn_chunk_kernel(gs_ref, gu_ref, whs_ref, whu_ref, o_ref, h_scr, c_scr,
                      *, t_chunk, thresh):
    @pl.when(pl.program_id(0) == 0)
    def _():
        h_scr[...] = jnp.zeros_like(h_scr)
        c_scr[...] = jnp.zeros_like(c_scr)

    whh_s = whs_ref[...]
    whh_u = whu_ref[...]

    def step(t, carry):
        h, c = carry
        g_s = gs_ref[t] + jnp.dot(h, whh_s, preferred_element_type=jnp.float32)
        g_u = gu_ref[t] + jnp.dot(h, whh_u, preferred_element_type=jnp.float32)
        sigma = jax.nn.sigmoid(g_s)                     # decay gate
        c_new = sigma * c + (1.0 - sigma) * g_u         # leaky integration
        spike = (c_new > thresh).astype(jnp.float32)    # Heaviside spike
        o_ref[t] = spike.astype(o_ref.dtype)
        return spike, c_new

    h, c = jax.lax.fori_loop(0, t_chunk, step,
                             (h_scr[...], c_scr[...]), unroll=True)
    h_scr[...] = h
    c_scr[...] = c


def gsn_recurrent(gs, gu, whh_s, whh_u, *, t_chunk=16, thresh=0.5):
    T, B, H = gs.shape
    tc = min(t_chunk, T)
    Tp = _round_up(T, tc)
    if Tp != T:
        pad = ((0, Tp - T), (0, 0), (0, 0))
        gs = jnp.pad(gs, pad)
        gu = jnp.pad(gu, pad)

    kernel = functools.partial(_gsn_chunk_kernel, t_chunk=tc, thresh=thresh)
    out = pl.pallas_call(
        kernel,
        out_shape=jax.ShapeDtypeStruct((Tp, B, H), jnp.float32),
        grid_spec=pltpu.PrefetchScalarGridSpec(
            num_scalar_prefetch=0,
            grid=(Tp // tc,),
            in_specs=[
                pl.BlockSpec((tc, B, H), lambda i: (i, 0, 0)),
                pl.BlockSpec((tc, B, H), lambda i: (i, 0, 0)),
                pl.BlockSpec((H, H), lambda i: (0, 0)),   # W_hh sigma-half
                pl.BlockSpec((H, H), lambda i: (0, 0)),   # W_hh u-half
            ],
            out_specs=pl.BlockSpec((tc, B, H), lambda i: (i, 0, 0)),
            scratch_shapes=[pltpu.VMEM((B, H), jnp.float32),   # h (spikes)
                            pltpu.VMEM((B, H), jnp.float32)],  # c (membrane)
        ),
        compiler_params=pltpu.CompilerParams(
            dimension_semantics=("arbitrary",),
            vmem_limit_bytes=_VMEM_LIMIT),
    )(gs, gu, whh_s, whh_u)
    return out[:T]


# --------------------------------------------------------------------------
# Kernel C: projection Linear(hidden_size -> proj_size), row-tiled.
# TODO(synk): P < 128 lanes -> masked partial stores; fuse into the last GSN
# chunk epilogue or widen the stored last dim for production shapes.
# --------------------------------------------------------------------------
def _proj_kernel(x_ref, w_ref, b_ref, o_ref):
    o_ref[...] = (jnp.dot(x_ref[...], w_ref[...],
                          preferred_element_type=jnp.float32)
                  + b_ref[...]).astype(o_ref.dtype)


def linear_proj(x2d, w, b, *, row_tile=512):
    M, K = x2d.shape
    P = w.shape[1]
    rt = min(row_tile, _round_up(M, 8))
    Mp = _round_up(M, rt)
    if Mp != M:
        x2d = jnp.pad(x2d, ((0, Mp - M), (0, 0)))
    out = pl.pallas_call(
        _proj_kernel,
        out_shape=jax.ShapeDtypeStruct((Mp, P), jnp.float32),
        grid_spec=pltpu.PrefetchScalarGridSpec(
            num_scalar_prefetch=0,
            grid=(Mp // rt,),
            in_specs=[pl.BlockSpec((rt, K), lambda i: (i, 0)),
                      pl.BlockSpec((K, P), lambda i: (0, 0)),
                      pl.BlockSpec((1, P), lambda i: (0, 0))],
            out_specs=pl.BlockSpec((rt, P), lambda i: (i, 0)),
        ),
        compiler_params=pltpu.CompilerParams(
            dimension_semantics=("parallel",),
            vmem_limit_bytes=_VMEM_LIMIT),
    )(x2d, w, b.reshape(1, P))
    return out[:M]


# --------------------------------------------------------------------------
# Model forward (glue in plain JAX around the Pallas kernels).
# --------------------------------------------------------------------------
def sub_band_sequence_model(params, input_features, *, df_order, hidden_size,
                            num_layers, proj_size, t_chunk=16):
    b, n, c, fs, t = input_features.shape
    assert c == 1, "Only mono audio is supported."
    H = hidden_size

    # rearrange 'b n c fs t -> (b n) (c fs) t', then 'b f t -> t b f'
    x = input_features.reshape(b * n, c * fs, t)
    x = jnp.transpose(x, (2, 0, 1))                           # (T, B', F)

    all_layer_outputs = []
    h = x
    for layer in range(num_layers):
        w_ih = params[f"w_ih_{layer}"]                        # (F_in, 2H)
        w_hh = params[f"w_hh_{layer}"]                        # (H, 2H)
        bias = params[f"b_ih_{layer}"] + params[f"b_hh_{layer}"]  # folded bias
        ws, wu = w_ih[:, :H], w_ih[:, H:]                     # pre-split gates
        whs, whu = w_hh[:, :H], w_hh[:, H:]
        bs, bu = bias[:H], bias[H:]

        if layer == 0:
            gs, gu = gates_in(h, params["ln_gamma"], params["ln_beta"],
                              ws, wu, bs, bu, apply_ln=True)
        else:
            f_in = h.shape[-1]
            gs, gu = gates_in(h, jnp.ones((f_in,), jnp.float32),
                              jnp.zeros((f_in,), jnp.float32),
                              ws, wu, bs, bu, apply_ln=False)

        h = gsn_recurrent(gs, gu, whs, whu, t_chunk=t_chunk)
        all_layer_outputs.append(h)

    T, Bp, _ = h.shape
    out = linear_proj(h.reshape(T * Bp, H),
                      params["proj_w"], params["proj_b"]).reshape(T, Bp,
                                                                  proj_size)
    all_layer_outputs.append(out)

    # output_activate_function=None -> Identity
    out = jnp.transpose(out, (1, 2, 0))                       # 't b f -> b f t'

    # rearrange '(b n) (c fc df) t -> b df (n fc) t c' with c = num_channels*2
    c2 = 2 * c
    fc = proj_size // (c2 * df_order)
    out = out.reshape(b, n, c2, fc, df_order, t)
    out = jnp.transpose(out, (0, 4, 1, 3, 5, 2)).reshape(
        b, df_order, n * fc, t, c2)
    return out, all_layer_outputs


# --------------------------------------------------------------------------
# Deterministic parameter initialization (shapes per the module's __init__).
# --------------------------------------------------------------------------
def init_params(key, input_size, hidden_size, num_layers, proj_size):
    params = {
        "ln_gamma": jnp.ones((input_size,), jnp.float32),
        "ln_beta": jnp.zeros((input_size,), jnp.float32),
    }
    scale = 1.0 / float(hidden_size) ** 0.5
    in_size = input_size
    for layer in range(num_layers):
        key, k1, k2, k3, k4 = jax.random.split(key, 5)
        params[f"w_ih_{layer}"] = jax.random.uniform(
            k1, (in_size, 2 * hidden_size), jnp.float32, -scale, scale)
        params[f"w_hh_{layer}"] = jax.random.uniform(
            k2, (hidden_size, 2 * hidden_size), jnp.float32, -scale, scale)
        params[f"b_ih_{layer}"] = jax.random.uniform(
            k3, (2 * hidden_size,), jnp.float32, -scale, scale)
        params[f"b_hh_{layer}"] = jax.random.uniform(
            k4, (2 * hidden_size,), jnp.float32, -scale, scale)
        in_size = hidden_size
    key, kw, kb = jax.random.split(key, 3)
    params["proj_w"] = jax.random.uniform(
        kw, (hidden_size, proj_size), jnp.float32, -scale, scale)
    params["proj_b"] = jax.random.uniform(
        kb, (proj_size,), jnp.float32, -scale, scale)
    return params


if __name__ == "__main__":
    # Small config: input (b, n, c, fs, t) = (2, 3, 1, 16, 8),
    # hidden=32, num_layers=2, df_order=2, ctr_freq_size fc=4,
    # proj_size = (c*2) * fc * df = 16.
    batch, n_sub, n_ch, fs, T = 2, 3, 1, 16, 8
    hidden, num_layers, df_order, fc = 32, 2, 2, 4
    proj_size = (2 * n_ch) * fc * df_order

    key = jax.random.PRNGKey(0)
    kp, kx = jax.random.split(key)
    params = init_params(kp, n_ch * fs, hidden, num_layers, proj_size)
    input_features = jax.random.normal(kx, (batch, n_sub, n_ch, fs, T),
                                       jnp.float32)

    fwd = jax.jit(functools.partial(
        sub_band_sequence_model, df_order=df_order, hidden_size=hidden,
        num_layers=num_layers, proj_size=proj_size, t_chunk=16))

    out, layer_outs = fwd(params, input_features)

    out = jax.block_until_ready(out)
    for a in layer_outs:
        jax.block_until_ready(a)

    assert out.shape == (batch, df_order, n_sub * fc, T, 2 * n_ch), out.shape
    assert len(layer_outs) == num_layers + 1
    print("KERNEL_OK")
</pallas_src>

<mosaic_0001>
module attributes {stable_mosaic.version = 11 : i64} {
  func.func @_gates_in_kernel(%arg0: i32, %arg1: memref<48x16xf32, #tpu.memory_space<vmem>>, %arg2: memref<1x16xf32, #tpu.memory_space<vmem>>, %arg3: memref<1x16xf32, #tpu.memory_space<vmem>>, %arg4: memref<16x32xf32, #tpu.memory_space<vmem>>, %arg5: memref<16x32xf32, #tpu.memory_space<vmem>>, %arg6: memref<1x32xf32, #tpu.memory_space<vmem>>, %arg7: memref<1x32xf32, #tpu.memory_space<vmem>>, %arg8: memref<48x32xf32, #tpu.memory_space<vmem>>, %arg9: memref<48x32xf32, #tpu.memory_space<vmem>>) attributes {dimension_semantics = [#tpu.dimension_semantics<parallel>], iteration_bounds = array<i64: 1>, scalar_prefetch = 0 : i64, scratch_operands = 0 : i64, tpu.core_type = #tpu.core_type<tc>, window_params = [{transform_indices = @transform_0, window_bounds = array<i64: 48, 16>}, {pipeline_mode = #tpu.pipeline_mode<synchronous>, transform_indices = @transform_1, window_bounds = array<i64: 1, 16>}, {pipeline_mode = #tpu.pipeline_mode<synchronous>, transform_indices = @transform_2, window_bounds = array<i64: 1, 16>}, {pipeline_mode = #tpu.pipeline_mode<synchronous>, transform_indices = @transform_3, window_bounds = array<i64: 16, 32>}, {pipeline_mode = #tpu.pipeline_mode<synchronous>, transform_indices = @transform_4, window_bounds = array<i64: 16, 32>}, {pipeline_mode = #tpu.pipeline_mode<synchronous>, transform_indices = @transform_5, window_bounds = array<i64: 1, 32>}, {pipeline_mode = #tpu.pipeline_mode<synchronous>, transform_indices = @transform_6, window_bounds = array<i64: 1, 32>}, {transform_indices = @transform_7, window_bounds = array<i64: 48, 32>}, {transform_indices = @transform_8, window_bounds = array<i64: 48, 32>}]} {
    %c0 = arith.constant 0 : index
    %c0_0 = arith.constant 0 : index
    %0 = vector.load %arg1[%c0, %c0_0] : memref<48x16xf32, #tpu.memory_space<vmem>>, vector<48x16xf32>
    %cst = arith.constant dense<0.000000e+00> : vector<48xf32>
    %1 = vector.multi_reduction <add>, %0, %cst [1] : vector<48x16xf32> to vector<48xf32>
    %2 = vector.shape_cast %1 : vector<48xf32> to vector<48x1xf32>
    %cst_1 = arith.constant 1.600000e+01 : f32
    %3 = vector.broadcast %cst_1 : f32 to vector<48x1xf32>
    %4 = arith.divf %2, %3 : vector<48x1xf32>
    %5 = vector.broadcast %4 : vector<48x1xf32> to vector<48x16xf32>
    %6 = arith.subf %0, %5 : vector<48x16xf32>
    %7 = arith.mulf %6, %6 : vector<48x16xf32>
    %cst_2 = arith.constant dense<0.000000e+00> : vector<48xf32>
    %8 = vector.multi_reduction <add>, %7, %cst_2 [1] : vector<48x16xf32> to vector<48xf32>
    %9 = vector.shape_cast %8 : vector<48xf32> to vector<48x1xf32>
    %cst_3 = arith.constant 1.600000e+01 : f32
    %10 = vector.broadcast %cst_3 : f32 to vector<48x1xf32>
    %11 = arith.divf %9, %10 : vector<48x1xf32>
    %12 = vector.broadcast %4 : vector<48x1xf32> to vector<48x16xf32>
    %13 = arith.subf %0, %12 : vector<48x16xf32>
    %cst_4 = arith.constant 9.99999974E-6 : f32
    %14 = vector.broadcast %cst_4 : f32 to vector<48x1xf32>
    %15 = arith.addf %11, %14 : vector<48x1xf32>
    %16 = math.rsqrt %15 : vector<48x1xf32>
    %17 = vector.broadcast %16 : vector<48x1xf32> to vector<48x16xf32>
    %18 = arith.mulf %13, %17 : vector<48x16xf32>
    %c0_5 = arith.constant 0 : index
    %c0_6 = arith.constant 0 : index
    %19 = vector.load %arg2[%c0_5, %c0_6] : memref<1x16xf32, #tpu.memory_space<vmem>>, vector<1x16xf32>
    %20 = vector.broadcast %19 : vector<1x16xf32> to vector<48x16xf32>
    %21 = arith.mulf %18, %20 : vector<48x16xf32>
    %c0_7 = arith.constant 0 : index
    %c0_8 = arith.constant 0 : index
    %22 = vector.load %arg3[%c0_7, %c0_8] : memref<1x16xf32, #tpu.memory_space<vmem>>, vector<1x16xf32>
    %23 = vector.broadcast %22 : vector<1x16xf32> to vector<48x16xf32>
    %24 = arith.addf %21, %23 : vector<48x16xf32>
    %c0_9 = arith.constant 0 : index
    %c0_10 = arith.constant 0 : index
    %25 = vector.load %arg4[%c0_9, %c0_10] : memref<16x32xf32, #tpu.memory_space<vmem>>, vector<16x32xf32>
    %cst_11 = arith.constant dense<0.000000e+00> : vector<48x32xf32>
    %26 = tpu.matmul %24, %25, %cst_11 {dimension_numbers = #tpu.dot_dimension_numbers<[1], [0], [0], [1], [0, 0, 1, 1], [], []>} : vector<48x16xf32>, vector<16x32xf32>, vector<48x32xf32> -> vector<48x32xf32>
    %c0_12 = arith.constant 0 : index
    %c0_13 = arith.constant 0 : index
    %27 = vector.load %arg6[%c0_12, %c0_13] : memref<1x32xf32, #tpu.memory_space<vmem>>, vector<1x32xf32>
    %28 = vector.broadcast %27 : vector<1x32xf32> to vector<48x32xf32>
    %29 = arith.addf %26, %28 : vector<48x32xf32>
    %c0_14 = arith.constant 0 : index
    %c0_15 = arith.constant 0 : index
    %30 = vector.load %arg8[%c0_14, %c0_15] : memref<48x32xf32, #tpu.memory_space<vmem>>, vector<48x32xf32>
    tpu.vector_store %arg8[%c0_14, %c0_15], %29 {strides = array<i32>} : memref<48x32xf32, #tpu.memory_space<vmem>>, vector<48x32xf32>,
    %c0_16 = arith.constant 0 : index
    %c0_17 = arith.constant 0 : index
    %31 = vector.load %arg5[%c0_16, %c0_17] : memref<16x32xf32, #tpu.memory_space<vmem>>, vector<16x32xf32>
    %cst_18 = arith.constant dense<0.000000e+00> : vector<48x32xf32>
    %32 = tpu.matmul %24, %31, %cst_18 {dimension_numbers = #tpu.dot_dimension_numbers<[1], [0], [0], [1], [0, 0, 1, 1], [], []>} : vector<48x16xf32>, vector<16x32xf32>, vector<48x32xf32> -> vector<48x32xf32>
    %c0_19 = arith.constant 0 : index
    %c0_20 = arith.constant 0 : index
    %33 = vector.load %arg7[%c0_19, %c0_20] : memref<1x32xf32, #tpu.memory_space<vmem>>, vector<1x32xf32>
    %34 = vector.broadcast %33 : vector<1x32xf32> to vector<48x32xf32>
    %35 = arith.addf %32, %34 : vector<48x32xf32>
    %c0_21 = arith.constant 0 : index
    %c0_22 = arith.constant 0 : index
    %36 = vector.load %arg9[%c0_21, %c0_22] : memref<48x32xf32, #tpu.memory_space<vmem>>, vector<48x32xf32>
    tpu.vector_store %arg9[%c0_21, %c0_22], %35 {strides = array<i32>} : memref<48x32xf32, #tpu.memory_space<vmem>>, vector<48x32xf32>,
    return
  }
  func.func @transform_0(%arg0: i32) -> (i32, i32) {
    %c0_i32 = arith.constant 0 : i32
    %c0_i32_0 = arith.constant 0 : i32
    return %arg0, %c0_i32 : i32, i32
  }
  func.func @transform_1(%arg0: i32) -> (i32, i32) {
    %c0_i32 = arith.constant 0 : i32
    %c0_i32_0 = arith.constant 0 : i32
    %c0_i32_1 = arith.constant 0 : i32
    return %c0_i32, %c0_i32_0 : i32, i32
  }
  func.func @transform_2(%arg0: i32) -> (i32, i32) {
    %c0_i32 = arith.constant 0 : i32
    %c0_i32_0 = arith.constant 0 : i32
    %c0_i32_1 = arith.constant 0 : i32
    return %c0_i32, %c0_i32_0 : i32, i32
  }
  func.func @transform_3(%arg0: i32) -> (i32, i32) {
    %c0_i32 = arith.constant 0 : i32
    %c0_i32_0 = arith.constant 0 : i32
    %c0_i32_1 = arith.constant 0 : i32
    return %c0_i32, %c0_i32_0 : i32, i32
  }
  func.func @transform_4(%arg0: i32) -> (i32, i32) {
    %c0_i32 = arith.constant 0 : i32
    %c0_i32_0 = arith.constant 0 : i32
    %c0_i32_1 = arith.constant 0 : i32
    return %c0_i32, %c0_i32_0 : i32, i32
  }
  func.func @transform_5(%arg0: i32) -> (i32, i32) {
    %c0_i32 = arith.constant 0 : i32
    %c0_i32_0 = arith.constant 0 : i32
    %c0_i32_1 = arith.constant 0 : i32
    return %c0_i32, %c0_i32_0 : i32, i32
  }
  func.func @transform_6(%arg0: i32) -> (i32, i32) {
    %c0_i32 = arith.constant 0 : i32
    %c0_i32_0 = arith.constant 0 : i32
    %c0_i32_1 = arith.constant 0 : i32
    return %c0_i32, %c0_i32_0 : i32, i32
  }
  func.func @transform_7(%arg0: i32) -> (i32, i32) {
    %c0_i32 = arith.constant 0 : i32
    %c0_i32_0 = arith.constant 0 : i32
    return %arg0, %c0_i32 : i32, i32
  }
  func.func @transform_8(%arg0: i32) -> (i32, i32) {
    %c0_i32 = arith.constant 0 : i32
    %c0_i32_0 = arith.constant 0 : i32
    return %arg0, %c0_i32 : i32, i32
  }
}

module attributes {stable_mosaic.version = 11 : i64} {
  func.func @_gsn_chunk_kernel(%arg0: i32, %arg1: memref<8x6x32xf32, #tpu.memory_space<vmem>>, %arg2: memref<8x6x32xf32, #tpu.memory_space<vmem>>, %arg3: memref<32x32xf32, #tpu.memory_space<vmem>>, %arg4: memref<32x32xf32, #tpu.memory_space<vmem>>, %arg5: memref<8x6x32xf32, #tpu.memory_space<vmem>>, %arg6: memref<6x32xf32, #tpu.memory_space<vmem>>, %arg7: memref<6x32xf32, #tpu.memory_space<vmem>>) attributes {dimension_semantics = [#tpu.dimension_semantics<arbitrary>], iteration_bounds = array<i64: 1>, scalar_prefetch = 0 : i64, scratch_operands = 2 : i64, tpu.core_type = #tpu.core_type<tc>, window_params = [{transform_indices = @transform_0, window_bounds = array<i64: 8, 6, 32>}, {transform_indices = @transform_1, window_bounds = array<i64: 8, 6, 32>}, {pipeline_mode = #tpu.pipeline_mode<synchronous>, transform_indices = @transform_2, window_bounds = array<i64: 32, 32>}, {pipeline_mode = #tpu.pipeline_mode<synchronous>, transform_indices = @transform_3, window_bounds = array<i64: 32, 32>}, {transform_indices = @transform_4, window_bounds = array<i64: 8, 6, 32>}]} {
    %c0_i32 = arith.constant 0 : i32
    %0 = arith.cmpi eq, %arg0, %c0_i32 : i32
    %1 = arith.extui %0 : i1 to i32
    %c0_i32_0 = arith.constant 0 : i32
    %2 = arith.cmpi ne, %1, %c0_i32_0 : i32
    scf.if %2 {
      %cst_100 = arith.constant 0.000000e+00 : f32
      %233 = vector.broadcast %cst_100 : f32 to vector<6x32xf32>
      %c0_101 = arith.constant 0 : index
      %c0_102 = arith.constant 0 : index
      %234 = vector.load %arg6[%c0_101, %c0_102] : memref<6x32xf32, #tpu.memory_space<vmem>>, vector<6x32xf32>
      tpu.vector_store %arg6[%c0_101, %c0_102], %233 {strides = array<i32>} : memref<6x32xf32, #tpu.memory_space<vmem>>, vector<6x32xf32>,
      %cst_103 = arith.constant 0.000000e+00 : f32
      %235 = vector.broadcast %cst_103 : f32 to vector<6x32xf32>
      %c0_104 = arith.constant 0 : index
      %c0_105 = arith.constant 0 : index
      %236 = vector.load %arg7[%c0_104, %c0_105] : memref<6x32xf32, #tpu.memory_space<vmem>>, vector<6x32xf32>
      tpu.vector_store %arg7[%c0_104, %c0_105], %235 {strides = array<i32>} : memref<6x32xf32, #tpu.memory_space<vmem>>, vector<6x32xf32>,
    } else {
    }
    %c0 = arith.constant 0 : index
    %c0_1 = arith.constant 0 : index
    %3 = vector.load %arg3[%c0, %c0_1] : memref<32x32xf32, #tpu.memory_space<vmem>>, vector<32x32xf32>
    %c0_2 = arith.constant 0 : index
    %c0_3 = arith.constant 0 : index
    %4 = vector.load %arg4[%c0_2, %c0_3] : memref<32x32xf32, #tpu.memory_space<vmem>>, vector<32x32xf32>
    %c0_4 = arith.constant 0 : index
    %c0_5 = arith.constant 0 : index
    %5 = vector.load %arg6[%c0_4, %c0_5] : memref<6x32xf32, #tpu.memory_space<vmem>>, vector<6x32xf32>
    %c0_6 = arith.constant 0 : index
    %c0_7 = arith.constant 0 : index
    %6 = vector.load %arg7[%c0_6, %c0_7] : memref<6x32xf32, #tpu.memory_space<vmem>>, vector<6x32xf32>
    %c0_i32_8 = arith.constant 0 : i32
    %7 = arith.index_cast %c0_i32_8 : i32 to index
    %c0_9 = arith.constant 0 : index
    %c0_10 = arith.constant 0 : index
    %8 = vector.load %arg1[%7, %c0_9, %c0_10] : memref<8x6x32xf32, #tpu.memory_space<vmem>>, vector<1x6x32xf32>
    %9 = vector.shape_cast %8 : vector<1x6x32xf32> to vector<6x32xf32>
    %cst = arith.constant dense<0.000000e+00> : vector<6x32xf32>
    %10 = tpu.matmul %5, %3, %cst {dimension_numbers = #tpu.dot_dimension_numbers<[1], [0], [0], [1], [0, 0, 1, 1], [], []>} : vector<6x32xf32>, vector<32x32xf32>, vector<6x32xf32> -> vector<6x32xf32>
    %11 = arith.addf %9, %10 : vector<6x32xf32>
    %12 = arith.index_cast %c0_i32_8 : i32 to index
    %c0_11 = arith.constant 0 : index
    %c0_12 = arith.constant 0 : index
    %13 = vector.load %arg2[%12, %c0_11, %c0_12] : memref<8x6x32xf32, #tpu.memory_space<vmem>>, vector<1x6x32xf32>
    %14 = vector.shape_cast %13 : vector<1x6x32xf32> to vector<6x32xf32>
    %cst_13 = arith.constant dense<0.000000e+00> : vector<6x32xf32>
    %15 = tpu.matmul %5, %4, %cst_13 {dimension_numbers = #tpu.dot_dimension_numbers<[1], [0], [0], [1], [0, 0, 1, 1], [], []>} : vector<6x32xf32>, vector<32x32xf32>, vector<6x32xf32> -> vector<6x32xf32>
    %16 = arith.addf %14, %15 : vector<6x32xf32>
    %17 = arith.negf %11 : vector<6x32xf32>
    %18 = math.exp %17 : vector<6x32xf32>
    %cst_14 = arith.constant 1.000000e+00 : f32
    %19 = vector.broadcast %cst_14 : f32 to vector<6x32xf32>
    %20 = arith.addf %19, %18 : vector<6x32xf32>
    %21 = arith.divf %19, %20 : vector<6x32xf32>
    %22 = arith.mulf %21, %6 : vector<6x32xf32>
    %cst_15 = arith.constant 1.000000e+00 : f32
    %23 = vector.broadcast %cst_15 : f32 to vector<6x32xf32>
    %24 = arith.subf %23, %21 : vector<6x32xf32>
    %25 = arith.mulf %24, %16 : vector<6x32xf32>
    %26 = arith.addf %22, %25 : vector<6x32xf32>
    %cst_16 = arith.constant 5.000000e-01 : f32
    %27 = vector.broadcast %cst_16 : f32 to vector<6x32xf32>
    %28 = arith.cmpf ogt, %26, %27 : vector<6x32xf32>
    %29 = arith.extui %28 : vector<6x32xi1> to vector<6x32xi32>
    %30 = arith.sitofp %29 : vector<6x32xi32> to vector<6x32xf32>
    %31 = arith.index_cast %c0_i32_8 : i32 to index
    %c0_17 = arith.constant 0 : index
    %c0_18 = arith.constant 0 : index
    %32 = vector.load %arg5[%31, %c0_17, %c0_18] : memref<8x6x32xf32, #tpu.memory_space<vmem>>, vector<1x6x32xf32>
    %33 = vector.shape_cast %32 : vector<1x6x32xf32> to vector<6x32xf32>
    %34 = vector.shape_cast %30 : vector<6x32xf32> to vector<1x6x32xf32>
    tpu.vector_store %arg5[%31, %c0_17, %c0_18], %34 {strides = array<i32>} : memref<8x6x32xf32, #tpu.memory_space<vmem>>, vector<1x6x32xf32>,
    %c1_i32 = arith.constant 1 : i32
    %35 = arith.index_cast %c1_i32 : i32 to index
    %c0_19 = arith.constant 0 : index
    %c0_20 = arith.constant 0 : index
    %36 = vector.load %arg1[%35, %c0_19, %c0_20] : memref<8x6x32xf32, #tpu.memory_space<vmem>>, vector<1x6x32xf32>
    %37 = vector.shape_cast %36 : vector<1x6x32xf32> to vector<6x32xf32>
    %cst_21 = arith.constant dense<0.000000e+00> : vector<6x32xf32>
    %38 = tpu.matmul %30, %3, %cst_21 {dimension_numbers = #tpu.dot_dimension_numbers<[1], [0], [0], [1], [0, 0, 1, 1], [], []>} : vector<6x32xf32>, vector<32x32xf32>, vector<6x32xf32> -> vector<6x32xf32>
    %39 = arith.addf %37, %38 : vector<6x32xf32>
    %40 = arith.index_cast %c1_i32 : i32 to index
    %c0_22 = arith.constant 0 : index
    %c0_23 = arith.constant 0 : index
    %41 = vector.load %arg2[%40, %c0_22, %c0_23] : memref<8x6x32xf32, #tpu.memory_space<vmem>>, vector<1x6x32xf32>
    %42 = vector.shape_cast %41 : vector<1x6x32xf32> to vector<6x32xf32>
    %cst_24 = arith.constant dense<0.000000e+00> : vector<6x32xf32>
    %43 = tpu.matmul %30, %4, %cst_24 {dimension_numbers = #tpu.dot_dimension_numbers<[1], [0], [0], [1], [0, 0, 1, 1], [], []>} : vector<6x32xf32>, vector<32x32xf32>, vector<6x32xf32> -> vector<6x32xf32>
    %44 = arith.addf %42, %43 : vector<6x32xf32>
    %45 = arith.negf %39 : vector<6x32xf32>
    %46 = math.exp %45 : vector<6x32xf32>
    %cst_25 = arith.constant 1.000000e+00 : f32
    %47 = vector.broadcast %cst_25 : f32 to vector<6x32xf32>
    %48 = arith.addf %47, %46 : vector<6x32xf32>
    %49 = arith.divf %47, %48 : vector<6x32xf32>
    %50 = arith.mulf %49, %26 : vector<6x32xf32>
    %cst_26 = arith.constant 1.000000e+00 : f32
    %51 = vector.broadcast %cst_26 : f32 to vector<6x32xf32>
    %52 = arith.subf %51, %49 : vector<6x32xf32>
    %53 = arith.mulf %52, %44 : vector<6x32xf32>
    %54 = arith.addf %50, %53 : vector<6x32xf32>
    %cst_27 = arith.constant 5.000000e-01 : f32
    %55 = vector.broadcast %cst_27 : f32 to vector<6x32xf32>
    %56 = arith.cmpf ogt, %54, %55 : vector<6x32xf32>
    %57 = arith.extui %56 : vector<6x32xi1> to vector<6x32xi32>
    %58 = arith.sitofp %57 : vector<6x32xi32> to vector<6x32xf32>
    %59 = arith.index_cast %c1_i32 : i32 to index
    %c0_28 = arith.constant 0 : index
    %c0_29 = arith.constant 0 : index
    %60 = vector.load %arg5[%59, %c0_28, %c0_29] : memref<8x6x32xf32, #tpu.memory_space<vmem>>, vector<1x6x32xf32>
    %61 = vector.shape_cast %60 : vector<1x6x32xf32> to vector<6x32xf32>
    %62 = vector.shape_cast %58 : vector<6x32xf32> to vector<1x6x32xf32>
    tpu.vector_store %arg5[%59, %c0_28, %c0_29], %62 {strides = array<i32>} : memref<8x6x32xf32, #tpu.memory_space<vmem>>, vector<1x6x32xf32>,
    %c2_i32 = arith.constant 2 : i32
    %63 = arith.index_cast %c2_i32 : i32 to index
    %c0_30 = arith.constant 0 : index
    %c0_31 = arith.constant 0 : index
    %64 = vector.load %arg1[%63, %c0_30, %c0_31] : memref<8x6x32xf32, #tpu.memory_space<vmem>>, vector<1x6x32xf32>
    %65 = vector.shape_cast %64 : vector<1x6x32xf32> to vector<6x32xf32>
    %cst_32 = arith.constant dense<0.000000e+00> : vector<6x32xf32>
    %66 = tpu.matmul %58, %3, %cst_32 {dimension_numbers = #tpu.dot_dimension_numbers<[1], [0], [0], [1], [0, 0, 1, 1], [], []>} : vector<6x32xf32>, vector<32x32xf32>, vector<6x32xf32> -> vector<6x32xf32>
    %67 = arith.addf %65, %66 : vector<6x32xf32>
    %68 = arith.index_cast %c2_i32 : i32 to index
    %c0_33 = arith.constant 0 : index
    %c0_34 = arith.constant 0 : index
    %69 = vector.load %arg2[%68, %c0_33, %c0_34] : memref<8x6x32xf32, #tpu.memory_space<vmem>>, vector<1x6x32xf32>
    %70 = vector.shape_cast %69 : vector<1x6x32xf32> to vector<6x32xf32>
    %cst_35 = arith.constant dense<0.000000e+00> : vector<6x32xf32>
    %71 = tpu.matmul %58, %4, %cst_35 {dimension_numbers = #tpu.dot_dimension_numbers<[1], [0], [0], [1], [0, 0, 1, 1], [], []>} : vector<6x32xf32>, vector<32x32xf32>, vector<6x32xf32> -> vector<6x32xf32>
    %72 = arith.addf %70, %71 : vector<6x32xf32>
    %73 = arith.negf %67 : vector<6x32xf32>
    %74 = math.exp %73 : vector<6x32xf32>
    %cst_36 = arith.constant 1.000000e+00 : f32
    %75 = vector.broadcast %cst_36 : f32 to vector<6x32xf32>
    %76 = arith.addf %75, %74 : vector<6x32xf32>
    %77 = arith.divf %75, %76 : vector<6x32xf32>
    %78 = arith.mulf %77, %54 : vector<6x32xf32>
    %cst_37 = arith.constant 1.000000e+00 : f32
    %79 = vector.broadcast %cst_37 : f32 to vector<6x32xf32>
    %80 = arith.subf %79, %77 : vector<6x32xf32>
    %81 = arith.mulf %80, %72 : vector<6x32xf32>
    %82 = arith.addf %78, %81 : vector<6x32xf32>
    %cst_38 = arith.constant 5.000000e-01 : f32
    %83 = vector.broadcast %cst_38 : f32 to vector<6x32xf32>
    %84 = arith.cmpf ogt, %82, %83 : vector<6x32xf32>
    %85 = arith.extui %84 : vector<6x32xi1> to vector<6x32xi32>
    %86 = arith.sitofp %85 : vector<6x32xi32> to vector<6x32xf32>
    %87 = arith.index_cast %c2_i32 : i32 to index
    %c0_39 = arith.constant 0 : index
    %c0_40 = arith.constant 0 : index
    %88 = vector.load %arg5[%87, %c0_39, %c0_40] : memref<8x6x32xf32, #tpu.memory_space<vmem>>, vector<1x6x32xf32>
    %89 = vector.shape_cast %88 : vector<1x6x32xf32> to vector<6x32xf32>
    %90 = vector.shape_cast %86 : vector<6x32xf32> to vector<1x6x32xf32>
    tpu.vector_store %arg5[%87, %c0_39, %c0_40], %90 {strides = array<i32>} : memref<8x6x32xf32, #tpu.memory_space<vmem>>, vector<1x6x32xf32>,
    %c3_i32 = arith.constant 3 : i32
    %91 = arith.index_cast %c3_i32 : i32 to index
    %c0_41 = arith.constant 0 : index
    %c0_42 = arith.constant 0 : index
    %92 = vector.load %arg1[%91, %c0_41, %c0_42] : memref<8x6x32xf32, #tpu.memory_space<vmem>>, vector<1x6x32xf32>
    %93 = vector.shape_cast %92 : vector<1x6x32xf32> to vector<6x32xf32>
    %cst_43 = arith.constant dense<0.000000e+00> : vector<6x32xf32>
    %94 = tpu.matmul %86, %3, %cst_43 {dimension_numbers = #tpu.dot_dimension_numbers<[1], [0], [0], [1], [0, 0, 1, 1], [], []>} : vector<6x32xf32>, vector<32x32xf32>, vector<6x32xf32> -> vector<6x32xf32>
    %95 = arith.addf %93, %94 : vector<6x32xf32>
    %96 = arith.index_cast %c3_i32 : i32 to index
    %c0_44 = arith.constant 0 : index
    %c0_45 = arith.constant 0 : index
    %97 = vector.load %arg2[%96, %c0_44, %c0_45] : memref<8x6x32xf32, #tpu.memory_space<vmem>>, vector<1x6x32xf32>
    %98 = vector.shape_cast %97 : vector<1x6x32xf32> to vector<6x32xf32>
    %cst_46 = arith.constant dense<0.000000e+00> : vector<6x32xf32>
    %99 = tpu.matmul %86, %4, %cst_46 {dimension_numbers = #tpu.dot_dimension_numbers<[1], [0], [0], [1], [0, 0, 1, 1], [], []>} : vector<6x32xf32>, vector<32x32xf32>, vector<6x32xf32> -> vector<6x32xf32>
    %100 = arith.addf %98, %99 : vector<6x32xf32>
    %101 = arith.negf %95 : vector<6x32xf32>
    %102 = math.exp %101 : vector<6x32xf32>
    %cst_47 = arith.constant 1.000000e+00 : f32
    %103 = vector.broadcast %cst_47 : f32 to vector<6x32xf32>
    %104 = arith.addf %103, %102 : vector<6x32xf32>
    %105 = arith.divf %103, %104 : vector<6x32xf32>
    %106 = arith.mulf %105, %82 : vector<6x32xf32>
    %cst_48 = arith.constant 1.000000e+00 : f32
    %107 = vector.broadcast %cst_48 : f32 to vector<6x32xf32>
    %108 = arith.subf %107, %105 : vector<6x32xf32>
    %109 = arith.mulf %108, %100 : vector<6x32xf32>
    %110 = arith.addf %106, %109 : vector<6x32xf32>
    %cst_49 = arith.constant 5.000000e-01 : f32
    %111 = vector.broadcast %cst_49 : f32 to vector<6x32xf32>
    %112 = arith.cmpf ogt, %110, %111 : vector<6x32xf32>
    %113 = arith.extui %112 : vector<6x32xi1> to vector<6x32xi32>
    %114 = arith.sitofp %113 : vector<6x32xi32> to vector<6x32xf32>
    %115 = arith.index_cast %c3_i32 : i32 to index
    %c0_50 = arith.constant 0 : index
    %c0_51 = arith.constant 0 : index
    %116 = vector.load %arg5[%115, %c0_50, %c0_51] : memref<8x6x32xf32, #tpu.memory_space<vmem>>, vector<1x6x32xf32>
    %117 = vector.shape_cast %116 : vector<1x6x32xf32> to vector<6x32xf32>
    %118 = vector.shape_cast %114 : vector<6x32xf32> to vector<1x6x32xf32>
    tpu.vector_store %arg5[%115, %c0_50, %c0_51], %118 {strides = array<i32>} : memref<8x6x32xf32, #tpu.memory_space<vmem>>, vector<1x6x32xf32>,
    %c4_i32 = arith.constant 4 : i32
    %119 = arith.index_cast %c4_i32 : i32 to index
    %c0_52 = arith.constant 0 : index
    %c0_53 = arith.constant 0 : index
    %120 = vector.load %arg1[%119, %c0_52, %c0_53] : memref<8x6x32xf32, #tpu.memory_space<vmem>>, vector<1x6x32xf32>
    %121 = vector.shape_cast %120 : vector<1x6x32xf32> to vector<6x32xf32>
    %cst_54 = arith.constant dense<0.000000e+00> : vector<6x32xf32>
    %122 = tpu.matmul %114, %3, %cst_54 {dimension_numbers = #tpu.dot_dimension_numbers<[1], [0], [0], [1], [0, 0, 1, 1], [], []>} : vector<6x32xf32>, vector<32x32xf32>, vector<6x32xf32> -> vector<6x32xf32>
    %123 = arith.addf %121, %122 : vector<6x32xf32>
    %124 = arith.index_cast %c4_i32 : i32 to index
    %c0_55 = arith.constant 0 : index
    %c0_56 = arith.constant 0 : index
    %125 = vector.load %arg2[%124, %c0_55, %c0_56] : memref<8x6x32xf32, #tpu.memory_space<vmem>>, vector<1x6x32xf32>
    %126 = vector.shape_cast %125 : vector<1x6x32xf32> to vector<6x32xf32>
    %cst_57 = arith.constant dense<0.000000e+00> : vector<6x32xf32>
    %127 = tpu.matmul %114, %4, %cst_57 {dimension_numbers = #tpu.dot_dimension_numbers<[1], [0], [0], [1], [0, 0, 1, 1], [], []>} : vector<6x32xf32>, vector<32x32xf32>, vector<6x32xf32> -> vector<6x32xf32>
    %128 = arith.addf %126, %127 : vector<6x32xf32>
    %129 = arith.negf %123 : vector<6x32xf32>
    %130 = math.exp %129 : vector<6x32xf32>
    %cst_58 = arith.constant 1.000000e+00 : f32
    %131 = vector.broadcast %cst_58 : f32 to vector<6x32xf32>
    %132 = arith.addf %131, %130 : vector<6x32xf32>
    %133 = arith.divf %131, %132 : vector<6x32xf32>
    %134 = arith.mulf %133, %110 : vector<6x32xf32>
    %cst_59 = arith.constant 1.000000e+00 : f32
    %135 = vector.broadcast %cst_59 : f32 to vector<6x32xf32>
    %136 = arith.subf %135, %133 : vector<6x32xf32>
    %137 = arith.mulf %136, %128 : vector<6x32xf32>
    %138 = arith.addf %134, %137 : vector<6x32xf32>
    %cst_60 = arith.constant 5.000000e-01 : f32
    %139 = vector.broadcast %cst_60 : f32 to vector<6x32xf32>
    %140 = arith.cmpf ogt, %138, %139 : vector<6x32xf32>
    %141 = arith.extui %140 : vector<6x32xi1> to vector<6x32xi32>
    %142 = arith.sitofp %141 : vector<6x32xi32> to vector<6x32xf32>
    %143 = arith.index_cast %c4_i32 : i32 to index
    %c0_61 = arith.constant 0 : index
    %c0_62 = arith.constant 0 : index
    %144 = vector.load %arg5[%143, %c0_61, %c0_62] : memref<8x6x32xf32, #tpu.memory_space<vmem>>, vector<1x6x32xf32>
    %145 = vector.shape_cast %144 : vector<1x6x32xf32> to vector<6x32xf32>
    %146 = vector.shape_cast %142 : vector<6x32xf32> to vector<1x6x32xf32>
    tpu.vector_store %arg5[%143, %c0_61, %c0_62], %146 {strides = array<i32>} : memref<8x6x32xf32, #tpu.memory_space<vmem>>, vector<1x6x32xf32>,
    %c5_i32 = arith.constant 5 : i32
    %147 = arith.index_cast %c5_i32 : i32 to index
    %c0_63 = arith.constant 0 : index
    %c0_64 = arith.constant 0 : index
    %148 = vector.load %arg1[%147, %c0_63, %c0_64] : memref<8x6x32xf32, #tpu.memory_space<vmem>>, vector<1x6x32xf32>
    %149 = vector.shape_cast %148 : vector<1x6x32xf32> to vector<6x32xf32>
    %cst_65 = arith.constant dense<0.000000e+00> : vector<6x32xf32>
    %150 = tpu.matmul %142, %3, %cst_65 {dimension_numbers = #tpu.dot_dimension_numbers<[1], [0], [0], [1], [0, 0, 1, 1], [], []>} : vector<6x32xf32>, vector<32x32xf32>, vector<6x32xf32> -> vector<6x32xf32>
    %151 = arith.addf %149, %150 : vector<6x32xf32>
    %152 = arith.index_cast %c5_i32 : i32 to index
    %c0_66 = arith.constant 0 : index
    %c0_67 = arith.constant 0 : index
    %153 = vector.load %arg2[%152, %c0_66, %c0_67] : memref<8x6x32xf32, #tpu.memory_space<vmem>>, vector<1x6x32xf32>
    %154 = vector.shape_cast %153 : vector<1x6x32xf32> to vector<6x32xf32>
    %cst_68 = arith.constant dense<0.000000e+00> : vector<6x32xf32>
    %155 = tpu.matmul %142, %4, %cst_68 {dimension_numbers = #tpu.dot_dimension_numbers<[1], [0], [0], [1], [0, 0, 1, 1], [], []>} : vector<6x32xf32>, vector<32x32xf32>, vector<6x32xf32> -> vector<6x32xf32>
    %156 = arith.addf %154, %155 : vector<6x32xf32>
    %157 = arith.negf %151 : vector<6x32xf32>
    %158 = math.exp %157 : vector<6x32xf32>
    %cst_69 = arith.constant 1.000000e+00 : f32
    %159 = vector.broadcast %cst_69 : f32 to vector<6x32xf32>
    %160 = arith.addf %159, %158 : vector<6x32xf32>
    %161 = arith.divf %159, %160 : vector<6x32xf32>
    %162 = arith.mulf %161, %138 : vector<6x32xf32>
    %cst_70 = arith.constant 1.000000e+00 : f32
    %163 = vector.broadcast %cst_70 : f32 to vector<6x32xf32>
    %164 = arith.subf %163, %161 : vector<6x32xf32>
    %165 = arith.mulf %164, %156 : vector<6x32xf32>
    %166 = arith.addf %162, %165 : vector<6x32xf32>
    %cst_71 = arith.constant 5.000000e-01 : f32
    %167 = vector.broadcast %cst_71 : f32 to vector<6x32xf32>
    %168 = arith.cmpf ogt, %166, %167 : vector<6x32xf32>
    %169 = arith.extui %168 : vector<6x32xi1> to vector<6x32xi32>
    %170 = arith.sitofp %169 : vector<6x32xi32> to vector<6x32xf32>
    %171 = arith.index_cast %c5_i32 : i32 to index
    %c0_72 = arith.constant 0 : index
    %c0_73 = arith.constant 0 : index
    %172 = vector.load %arg5[%171, %c0_72, %c0_73] : memref<8x6x32xf32, #tpu.memory_space<vmem>>, vector<1x6x32xf32>
    %173 = vector.shape_cast %172 : vector<1x6x32xf32> to vector<6x32xf32>
    %174 = vector.shape_cast %170 : vector<6x32xf32> to vector<1x6x32xf32>
    tpu.vector_store %arg5[%171, %c0_72, %c0_73], %174 {strides = array<i32>} : memref<8x6x32xf32, #tpu.memory_space<vmem>>, vector<1x6x32xf32>,
    %c6_i32 = arith.constant 6 : i32
    %175 = arith.index_cast %c6_i32 : i32 to index
    %c0_74 = arith.constant 0 : index
    %c0_75 = arith.constant 0 : index
    %176 = vector.load %arg1[%175, %c0_74, %c0_75] : memref<8x6x32xf32, #tpu.memory_space<vmem>>, vector<1x6x32xf32>
    %177 = vector.shape_cast %176 : vector<1x6x32xf32> to vector<6x32xf32>
    %cst_76 = arith.constant dense<0.000000e+00> : vector<6x32xf32>
    %178 = tpu.matmul %170, %3, %cst_76 {dimension_numbers = #tpu.dot_dimension_numbers<[1], [0], [0], [1], [0, 0, 1, 1], [], []>} : vector<6x32xf32>, vector<32x32xf32>, vector<6x32xf32> -> vector<6x32xf32>
    %179 = arith.addf %177, %178 : vector<6x32xf32>
    %180 = arith.index_cast %c6_i32 : i32 to index
    %c0_77 = arith.constant 0 : index
    %c0_78 = arith.constant 0 : index
    %181 = vector.load %arg2[%180, %c0_77, %c0_78] : memref<8x6x32xf32, #tpu.memory_space<vmem>>, vector<1x6x32xf32>
    %182 = vector.shape_cast %181 : vector<1x6x32xf32> to vector<6x32xf32>
    %cst_79 = arith.constant dense<0.000000e+00> : vector<6x32xf32>
    %183 = tpu.matmul %170, %4, %cst_79 {dimension_numbers = #tpu.dot_dimension_numbers<[1], [0], [0], [1], [0, 0, 1, 1], [], []>} : vector<6x32xf32>, vector<32x32xf32>, vector<6x32xf32> -> vector<6x32xf32>
    %184 = arith.addf %182, %183 : vector<6x32xf32>
    %185 = arith.negf %179 : vector<6x32xf32>
    %186 = math.exp %185 : vector<6x32xf32>
    %cst_80 = arith.constant 1.000000e+00 : f32
    %187 = vector.broadcast %cst_80 : f32 to vector<6x32xf32>
    %188 = arith.addf %187, %186 : vector<6x32xf32>
    %189 = arith.divf %187, %188 : vector<6x32xf32>
    %190 = arith.mulf %189, %166 : vector<6x32xf32>
    %cst_81 = arith.constant 1.000000e+00 : f32
    %191 = vector.broadcast %cst_81 : f32 to vector<6x32xf32>
    %192 = arith.subf %191, %189 : vector<6x32xf32>
    %193 = arith.mulf %192, %184 : vector<6x32xf32>
    %194 = arith.addf %190, %193 : vector<6x32xf32>
    %cst_82 = arith.constant 5.000000e-01 : f32
    %195 = vector.broadcast %cst_82 : f32 to vector<6x32xf32>
    %196 = arith.cmpf ogt, %194, %195 : vector<6x32xf32>
    %197 = arith.extui %196 : vector<6x32xi1> to vector<6x32xi32>
    %198 = arith.sitofp %197 : vector<6x32xi32> to vector<6x32xf32>
    %199 = arith.index_cast %c6_i32 : i32 to index
    %c0_83 = arith.constant 0 : index
    %c0_84 = arith.constant 0 : index
    %200 = vector.load %arg5[%199, %c0_83, %c0_84] : memref<8x6x32xf32, #tpu.memory_space<vmem>>, vector<1x6x32xf32>
    %201 = vector.shape_cast %200 : vector<1x6x32xf32> to vector<6x32xf32>
    %202 = vector.shape_cast %198 : vector<6x32xf32> to vector<1x6x32xf32>
    tpu.vector_store %arg5[%199, %c0_83, %c0_84], %202 {strides = array<i32>} : memref<8x6x32xf32, #tpu.memory_space<vmem>>, vector<1x6x32xf32>,
    %c7_i32 = arith.constant 7 : i32
    %203 = arith.index_cast %c7_i32 : i32 to index
    %c0_85 = arith.constant 0 : index
    %c0_86 = arith.constant 0 : index
    %204 = vector.load %arg1[%203, %c0_85, %c0_86] : memref<8x6x32xf32, #tpu.memory_space<vmem>>, vector<1x6x32xf32>
    %205 = vector.shape_cast %204 : vector<1x6x32xf32> to vector<6x32xf32>
    %cst_87 = arith.constant dense<0.000000e+00> : vector<6x32xf32>
    %206 = tpu.matmul %198, %3, %cst_87 {dimension_numbers = #tpu.dot_dimension_numbers<[1], [0], [0], [1], [0, 0, 1, 1], [], []>} : vector<6x32xf32>, vector<32x32xf32>, vector<6x32xf32> -> vector<6x32xf32>
    %207 = arith.addf %205, %206 : vector<6x32xf32>
    %208 = arith.index_cast %c7_i32 : i32 to index
    %c0_88 = arith.constant 0 : index
    %c0_89 = arith.constant 0 : index
    %209 = vector.load %arg2[%208, %c0_88, %c0_89] : memref<8x6x32xf32, #tpu.memory_space<vmem>>, vector<1x6x32xf32>
    %210 = vector.shape_cast %209 : vector<1x6x32xf32> to vector<6x32xf32>
    %cst_90 = arith.constant dense<0.000000e+00> : vector<6x32xf32>
    %211 = tpu.matmul %198, %4, %cst_90 {dimension_numbers = #tpu.dot_dimension_numbers<[1], [0], [0], [1], [0, 0, 1, 1], [], []>} : vector<6x32xf32>, vector<32x32xf32>, vector<6x32xf32> -> vector<6x32xf32>
    %212 = arith.addf %210, %211 : vector<6x32xf32>
    %213 = arith.negf %207 : vector<6x32xf32>
    %214 = math.exp %213 : vector<6x32xf32>
    %cst_91 = arith.constant 1.000000e+00 : f32
    %215 = vector.broadcast %cst_91 : f32 to vector<6x32xf32>
    %216 = arith.addf %215, %214 : vector<6x32xf32>
    %217 = arith.divf %215, %216 : vector<6x32xf32>
    %218 = arith.mulf %217, %194 : vector<6x32xf32>
    %cst_92 = arith.constant 1.000000e+00 : f32
    %219 = vector.broadcast %cst_92 : f32 to vector<6x32xf32>
    %220 = arith.subf %219, %217 : vector<6x32xf32>
    %221 = arith.mulf %220, %212 : vector<6x32xf32>
    %222 = arith.addf %218, %221 : vector<6x32xf32>
    %cst_93 = arith.constant 5.000000e-01 : f32
    %223 = vector.broadcast %cst_93 : f32 to vector<6x32xf32>
    %224 = arith.cmpf ogt, %222, %223 : vector<6x32xf32>
    %225 = arith.extui %224 : vector<6x32xi1> to vector<6x32xi32>
    %226 = arith.sitofp %225 : vector<6x32xi32> to vector<6x32xf32>
    %227 = arith.index_cast %c7_i32 : i32 to index
    %c0_94 = arith.constant 0 : index
    %c0_95 = arith.constant 0 : index
    %228 = vector.load %arg5[%227, %c0_94, %c0_95] : memref<8x6x32xf32, #tpu.memory_space<vmem>>, vector<1x6x32xf32>
    %229 = vector.shape_cast %228 : vector<1x6x32xf32> to vector<6x32xf32>
    %230 = vector.shape_cast %226 : vector<6x32xf32> to vector<1x6x32xf32>
    tpu.vector_store %arg5[%227, %c0_94, %c0_95], %230 {strides = array<i32>} : memref<8x6x32xf32, #tpu.memory_space<vmem>>, vector<1x6x32xf32>,
    %c8_i32 = arith.constant 8 : i32
    %c0_96 = arith.constant 0 : index
    %c0_97 = arith.constant 0 : index
    %231 = vector.load %arg6[%c0_96, %c0_97] : memref<6x32xf32, #tpu.memory_space<vmem>>, vector<6x32xf32>
    tpu.vector_store %arg6[%c0_96, %c0_97], %226 {strides = array<i32>} : memref<6x32xf32, #tpu.memory_space<vmem>>, vector<6x32xf32>,
    %c0_98 = arith.constant 0 : index
    %c0_99 = arith.constant 0 : index
    %232 = vector.load %arg7[%c0_98, %c0_99] : memref<6x32xf32, #tpu.memory_space<vmem>>, vector<6x32xf32>
    tpu.vector_store %arg7[%c0_98, %c0_99], %222 {strides = array<i32>} : memref<6x32xf32, #tpu.memory_space<vmem>>, vector<6x32xf32>,
    return
  }
  func.func @transform_0(%arg0: i32) -> (i32, i32, i32) {
    %c0_i32 = arith.constant 0 : i32
    %c0_i32_0 = arith.constant 0 : i32
    %c0_i32_1 = arith.constant 0 : i32
    return %arg0, %c0_i32, %c0_i32_0 : i32, i32, i32
  }
  func.func @transform_1(%arg0: i32) -> (i32, i32, i32) {
    %c0_i32 = arith.constant 0 : i32
    %c0_i32_0 = arith.constant 0 : i32
    %c0_i32_1 = arith.constant 0 : i32
    return %arg0, %c0_i32, %c0_i32_0 : i32, i32, i32
  }
  func.func @transform_2(%arg0: i32) -> (i32, i32) {
    %c0_i32 = arith.constant 0 : i32
    %c0_i32_0 = arith.constant 0 : i32
    %c0_i32_1 = arith.constant 0 : i32
    return %c0_i32, %c0_i32_0 : i32, i32
  }
  func.func @transform_3(%arg0: i32) -> (i32, i32) {
    %c0_i32 = arith.constant 0 : i32
    %c0_i32_0 = arith.constant 0 : i32
    %c0_i32_1 = arith.constant 0 : i32
    return %c0_i32, %c0_i32_0 : i32, i32
  }
  func.func @transform_4(%arg0: i32) -> (i32, i32, i32) {
    %c0_i32 = arith.constant 0 : i32
    %c0_i32_0 = arith.constant 0 : i32
    %c0_i32_1 = arith.constant 0 : i32
    return %arg0, %c0_i32, %c0_i32_0 : i32, i32, i32
  }
}

module attributes {stable_mosaic.version = 11 : i64} {
  func.func @_proj_kernel(%arg0: i32, %arg1: memref<48x32xf32, #tpu.memory_space<vmem>>, %arg2: memref<32x16xf32, #tpu.memory_space<vmem>>, %arg3: memref<1x16xf32, #tpu.memory_space<vmem>>, %arg4: memref<48x16xf32, #tpu.memory_space<vmem>>) attributes {dimension_semantics = [#tpu.dimension_semantics<parallel>], iteration_bounds = array<i64: 1>, scalar_prefetch = 0 : i64, scratch_operands = 0 : i64, tpu.core_type = #tpu.core_type<tc>, window_params = [{transform_indices = @transform_0, window_bounds = array<i64: 48, 32>}, {pipeline_mode = #tpu.pipeline_mode<synchronous>, transform_indices = @transform_1, window_bounds = array<i64: 32, 16>}, {pipeline_mode = #tpu.pipeline_mode<synchronous>, transform_indices = @transform_2, window_bounds = array<i64: 1, 16>}, {transform_indices = @transform_3, window_bounds = array<i64: 48, 16>}]} {
    %c0 = arith.constant 0 : index
    %c0_0 = arith.constant 0 : index
    %0 = vector.load %arg1[%c0, %c0_0] : memref<48x32xf32, #tpu.memory_space<vmem>>, vector<48x32xf32>
    %c0_1 = arith.constant 0 : index
    %c0_2 = arith.constant 0 : index
    %1 = vector.load %arg2[%c0_1, %c0_2] : memref<32x16xf32, #tpu.memory_space<vmem>>, vector<32x16xf32>
    %cst = arith.constant dense<0.000000e+00> : vector<48x16xf32>
    %2 = tpu.matmul %0, %1, %cst {dimension_numbers = #tpu.dot_dimension_numbers<[1], [0], [0], [1], [0, 0, 1, 1], [], []>} : vector<48x32xf32>, vector<32x16xf32>, vector<48x16xf32> -> vector<48x16xf32>
    %c0_3 = arith.constant 0 : index
    %c0_4 = arith.constant 0 : index
    %3 = vector.load %arg3[%c0_3, %c0_4] : memref<1x16xf32, #tpu.memory_space<vmem>>, vector<1x16xf32>
    %4 = vector.broadcast %3 : vector<1x16xf32> to vector<48x16xf32>
    %5 = arith.addf %2, %4 : vector<48x16xf32>
    %c0_5 = arith.constant 0 : index
    %c0_6 = arith.constant 0 : index
    %6 = vector.load %arg4[%c0_5, %c0_6] : memref<48x16xf32, #tpu.memory_space<vmem>>, vector<48x16xf32>
    tpu.vector_store %arg4[%c0_5, %c0_6], %5 {strides = array<i32>} : memref<48x16xf32, #tpu.memory_space<vmem>>, vector<48x16xf32>,
    return
  }
  func.func @transform_0(%arg0: i32) -> (i32, i32) {
    %c0_i32 = arith.constant 0 : i32
    %c0_i32_0 = arith.constant 0 : i32
    return %arg0, %c0_i32 : i32, i32
  }
  func.func @transform_1(%arg0: i32) -> (i32, i32) {
    %c0_i32 = arith.constant 0 : i32
    %c0_i32_0 = arith.constant 0 : i32
    %c0_i32_1 = arith.constant 0 : i32
    return %c0_i32, %c0_i32_0 : i32, i32
  }
  func.func @transform_2(%arg0: i32) -> (i32, i32) {
    %c0_i32 = arith.constant 0 : i32
    %c0_i32_0 = arith.constant 0 : i32
    %c0_i32_1 = arith.constant 0 : i32
    return %c0_i32, %c0_i32_0 : i32, i32
  }
  func.func @transform_3(%arg0: i32) -> (i32, i32) {
    %c0_i32 = arith.constant 0 : i32
    %c0_i32_0 = arith.constant 0 : i32
    return %arg0, %c0_i32 : i32, i32
  }
}

module attributes {stable_mosaic.version = 11 : i64} {
  func.func @_gates_in_kernel(%arg0: i32, %arg1: memref<48x32xf32, #tpu.memory_space<vmem>>, %arg2: memref<1x32xf32, #tpu.memory_space<vmem>>, %arg3: memref<1x32xf32, #tpu.memory_space<vmem>>, %arg4: memref<32x32xf32, #tpu.memory_space<vmem>>, %arg5: memref<32x32xf32, #tpu.memory_space<vmem>>, %arg6: memref<1x32xf32, #tpu.memory_space<vmem>>, %arg7: memref<1x32xf32, #tpu.memory_space<vmem>>, %arg8: memref<48x32xf32, #tpu.memory_space<vmem>>, %arg9: memref<48x32xf32, #tpu.memory_space<vmem>>) attributes {dimension_semantics = [#tpu.dimension_semantics<parallel>], iteration_bounds = array<i64: 1>, scalar_prefetch = 0 : i64, scratch_operands = 0 : i64, tpu.core_type = #tpu.core_type<tc>, window_params = [{transform_indices = @transform_0, window_bounds = array<i64: 48, 32>}, {pipeline_mode = #tpu.pipeline_mode<synchronous>, transform_indices = @transform_1, window_bounds = array<i64: 1, 32>}, {pipeline_mode = #tpu.pipeline_mode<synchronous>, transform_indices = @transform_2, window_bounds = array<i64: 1, 32>}, {pipeline_mode = #tpu.pipeline_mode<synchronous>, transform_indices = @transform_3, window_bounds = array<i64: 32, 32>}, {pipeline_mode = #tpu.pipeline_mode<synchronous>, transform_indices = @transform_4, window_bounds = array<i64: 32, 32>}, {pipeline_mode = #tpu.pipeline_mode<synchronous>, transform_indices = @transform_5, window_bounds = array<i64: 1, 32>}, {pipeline_mode = #tpu.pipeline_mode<synchronous>, transform_indices = @transform_6, window_bounds = array<i64: 1, 32>}, {transform_indices = @transform_7, window_bounds = array<i64: 48, 32>}, {transform_indices = @transform_8, window_bounds = array<i64: 48, 32>}]} {
    %c0 = arith.constant 0 : index
    %c0_0 = arith.constant 0 : index
    %0 = vector.load %arg1[%c0, %c0_0] : memref<48x32xf32, #tpu.memory_space<vmem>>, vector<48x32xf32>
    %c0_1 = arith.constant 0 : index
    %c0_2 = arith.constant 0 : index
    %1 = vector.load %arg4[%c0_1, %c0_2] : memref<32x32xf32, #tpu.memory_space<vmem>>, vector<32x32xf32>
    %cst = arith.constant dense<0.000000e+00> : vector<48x32xf32>
    %2 = tpu.matmul %0, %1, %cst {dimension_numbers = #tpu.dot_dimension_numbers<[1], [0], [0], [1], [0, 0, 1, 1], [], []>} : vector<48x32xf32>, vector<32x32xf32>, vector<48x32xf32> -> vector<48x32xf32>
    %c0_3 = arith.constant 0 : index
    %c0_4 = arith.constant 0 : index
    %3 = vector.load %arg6[%c0_3, %c0_4] : memref<1x32xf32, #tpu.memory_space<vmem>>, vector<1x32xf32>
    %4 = vector.broadcast %3 : vector<1x32xf32> to vector<48x32xf32>
    %5 = arith.addf %2, %4 : vector<48x32xf32>
    %c0_5 = arith.constant 0 : index
    %c0_6 = arith.constant 0 : index
    %6 = vector.load %arg8[%c0_5, %c0_6] : memref<48x32xf32, #tpu.memory_space<vmem>>, vector<48x32xf32>
    tpu.vector_store %arg8[%c0_5, %c0_6], %5 {strides = array<i32>} : memref<48x32xf32, #tpu.memory_space<vmem>>, vector<48x32xf32>,
    %c0_7 = arith.constant 0 : index
    %c0_8 = arith.constant 0 : index
    %7 = vector.load %arg5[%c0_7, %c0_8] : memref<32x32xf32, #tpu.memory_space<vmem>>, vector<32x32xf32>
    %cst_9 = arith.constant dense<0.000000e+00> : vector<48x32xf32>
    %8 = tpu.matmul %0, %7, %cst_9 {dimension_numbers = #tpu.dot_dimension_numbers<[1], [0], [0], [1], [0, 0, 1, 1], [], []>} : vector<48x32xf32>, vector<32x32xf32>, vector<48x32xf32> -> vector<48x32xf32>
    %c0_10 = arith.constant 0 : index
    %c0_11 = arith.constant 0 : index
    %9 = vector.load %arg7[%c0_10, %c0_11] : memref<1x32xf32, #tpu.memory_space<vmem>>, vector<1x32xf32>
    %10 = vector.broadcast %9 : vector<1x32xf32> to vector<48x32xf32>
    %11 = arith.addf %8, %10 : vector<48x32xf32>
    %c0_12 = arith.constant 0 : index
    %c0_13 = arith.constant 0 : index
    %12 = vector.load %arg9[%c0_12, %c0_13] : memref<48x32xf32, #tpu.memory_space<vmem>>, vector<48x32xf32>
    tpu.vector_store %arg9[%c0_12, %c0_13], %11 {strides = array<i32>} : memref<48x32xf32, #tpu.memory_space<vmem>>, vector<48x32xf32>,
    return
  }
  func.func @transform_0(%arg0: i32) -> (i32, i32) {
    %c0_i32 = arith.constant 0 : i32
    %c0_i32_0 = arith.constant 0 : i32
    return %arg0, %c0_i32 : i32, i32
  }
  func.func @transform_1(%arg0: i32) -> (i32, i32) {
    %c0_i32 = arith.constant 0 : i32
    %c0_i32_0 = arith.constant 0 : i32
    %c0_i32_1 = arith.constant 0 : i32
    return %c0_i32, %c0_i32_0 : i32, i32
  }
  func.func @transform_2(%arg0: i32) -> (i32, i32) {
    %c0_i32 = arith.constant 0 : i32
    %c0_i32_0 = arith.constant 0 : i32
    %c0_i32_1 = arith.constant 0 : i32
    return %c0_i32, %c0_i32_0 : i32, i32
  }
  func.func @transform_3(%arg0: i32) -> (i32, i32) {
    %c0_i32 = arith.constant 0 : i32
    %c0_i32_0 = arith.constant 0 : i32
    %c0_i32_1 = arith.constant 0 : i32
    return %c0_i32, %c0_i32_0 : i32, i32
  }
  func.func @transform_4(%arg0: i32) -> (i32, i32) {
    %c0_i32 = arith.constant 0 : i32
    %c0_i32_0 = arith.constant 0 : i32
    %c0_i32_1 = arith.constant 0 : i32
    return %c0_i32, %c0_i32_0 : i32, i32
  }
  func.func @transform_5(%arg0: i32) -> (i32, i32) {
    %c0_i32 = arith.constant 0 : i32
    %c0_i32_0 = arith.constant 0 : i32
    %c0_i32_1 = arith.constant 0 : i32
    return %c0_i32, %c0_i32_0 : i32, i32
  }
  func.func @transform_6(%arg0: i32) -> (i32, i32) {
    %c0_i32 = arith.constant 0 : i32
    %c0_i32_0 = arith.constant 0 : i32
    %c0_i32_1 = arith.constant 0 : i32
    return %c0_i32, %c0_i32_0 : i32, i32
  }
  func.func @transform_7(%arg0: i32) -> (i32, i32) {
    %c0_i32 = arith.constant 0 : i32
    %c0_i32_0 = arith.constant 0 : i32
    return %arg0, %c0_i32 : i32, i32
  }
  func.func @transform_8(%arg0: i32) -> (i32, i32) {
    %c0_i32 = arith.constant 0 : i32
    %c0_i32_0 = arith.constant 0 : i32
    return %arg0, %c0_i32 : i32, i32
  }
}

</mosaic_0001>

<bundles_post_ra>
// kernel: sub_band_sequence_model.9
= control target key start
LH: loop header
LB: loop body
LE: loop exit
PB: predicated region body
PF: predicated region fallthrough
CT: control target
= control target key end

     0   :  { %vm31_vm0 = vcmask 261120   ;;  %vm145_vm1 = vcmask 130048   ;;  %s285_s1 = inlined_call_operand.vmem [shape: f32[32,16], index: 1, kind: input, shape index: {}]   ;;  %s286_s0 = inlined_call_operand.vmem [shape: f32[48,32], index: 0, kind: input, shape index: {}]   ;;  %s287_s2 = inlined_call_operand.vmem [shape: f32[1,16], index: 2, kind: input, shape index: {}]   ;;  %s288_s3 = inlined_call_operand.vmem [shape: f32[48,16], index: 3, kind: output, shape index: {}]  }
   0x1   :  { %v20_v0 = vld [vmem:[%s285_s1] sm:$0xff]  ;;  %v21_v1 = vld [vmem:[%s285_s1 + $0x8] sm:$0xff]  ;;  %v22_v2 = vld [vmem:[%s285_s1 + $0x10] sm:$0xff] }
   0x2   :  { %v190_v3 = vpack.c.bf16 %v21_v1, %v20_v0  ;;  %v23_v4 = vld [vmem:[%s285_s1 + $0x18] sm:$0xff]  ;;  %v16_v5 = vld [vmem:[%s286_s0 + $0x10] sm:$0xff]  ;;  %v14_v7 = vld [vmem:[%s286_s0] sm:$0xff] }
   0x3   :  { %v194_v6 = vpack.c.bf16 %v23_v4, %v22_v2  ;;  %184 = vmatprep.mubr.msk.f32.mxu1 %vm31_vm0, %v16_v5  ;;  %181 = vmatprep.mubr.msk.f32.mxu0 %vm31_vm0, %v14_v7  ;;  %v17_v8 = vld [vmem:[%s286_s0 + $0x18] sm:$0xff]  ;;  %v15_v9 = vld [vmem:[%s286_s0 + $0x8] sm:$0xff]  ;;  %v18_v10 = vld [vmem:[%s286_s0 + $0x20] sm:$0xff] }
   0x4   :  { %198 = vmatprep.subr.bf16.mxu1 %v190_v3  ;;  %191 = vmatprep.subr.bf16.mxu0 %v190_v3  ;;  %v19_v11 = vld [vmem:[%s286_s0 + $0x28] sm:$0xff]  ;;  %v156_v12 = vld [vmem:[%s287_s2] ss:$0 sm:$0xff] }
   0x5   :  { %200 = vmatpush3.bf16.msra.mxu1 %v190_v3  ;;  %193 = vmatpush3.bf16.msra.mxu0 %v190_v3 }
   0x6   :  { %199 = vmatprep.subr.bf16.mxu1 %v194_v6  ;;  %195 = vmatprep.subr.bf16.mxu0 %v194_v6 }
   0x9   :  { %201 = vmatpush3.bf16.msra.mxu1 %v194_v6  ;;  %197 = vmatpush3.bf16.msra.mxu0 %v194_v6 }
   0xc   :  { %185 = vmatmul.mubr.msk.f32.vlgmr.msra.gmra.mrb[0].mxu1 %vm31_vm0, %v17_v8  ;;  %182 = vmatmul.mubr.msk.f32.vlgmr.msra.gmra.mrb[0].mxu0 %vm31_vm0, %v15_v9 }
   0xd   :  { %187 = vmatprep.mubr.msk.f32.mxu1 %vm31_vm0, %v18_v10 }
  0x10   :  { %188 = vmatmul.mubr.msk.f32.gmra.mrb[2].mxu1 %vm31_vm0, %v19_v11 }
  0xdf   :  { %v186_v13 = vpop.f32.mrb[0].mxu1  ;;  %v183_v14 = vpop.f32.mrb[0].mxu0 }
  0xe0   :  { %v132_v15 = vadd.f32 %v186_v13, %v156_v12  ;;  %v126_v16 = vpop.f32.mrb[1].mxu1  ;;  %v122_v17 = vadd.f32 %v183_v14, %v156_v12  ;;  %v116_v18 = vpop.f32.mrb[1].mxu0 }
  0xe1   :  { %v127_v19 = vadd.f32 %v156_v12, %v126_v16  ;;  %v117_v20 = vadd.f32 %v156_v12, %v116_v18 }
  0xe2   :  { %149 = vst.msk [vmem:[%s288_s3 + $0x18] sm:$0xff] %vm145_vm1, %v132_v15  ;;  %147 = vst.msk [vmem:[%s288_s3 + $0x8] sm:$0xff] %vm145_vm1, %v122_v17 }
  0xe3   :  { %148 = vst.msk [vmem:[%s288_s3 + $0x10] sm:$0xff] %vm145_vm1, %v127_v19  ;;  %146 = vst.msk [vmem:[%s288_s3] sm:$0xff] %vm145_vm1, %v117_v20  ;;  %v189_v21 = vpop.f32.mrb[2].mxu1 }
  0xe4   :  { %v142_v22 = vadd.f32 %v189_v21, %v156_v12  ;;  %v136_v23 = vpop.f32.mrb[3].mxu1 }
  0xe5   :  { %v137_v24 = vadd.f32 %v156_v12, %v136_v23 }
  0xe6   :  { %151 = vst.msk [vmem:[%s288_s3 + $0x28] sm:$0xff] %vm145_vm1, %v142_v22 }
  0xe7   :  { %150 = vst.msk [vmem:[%s288_s3 + $0x20] sm:$0xff] %vm145_vm1, %v137_v24 }

// kernel: sub_band_sequence_model.7
= control target key start
LH: loop header
LB: loop body
LE: loop exit
PB: predicated region body
PF: predicated region fallthrough
CT: control target
= control target key end

     0   :  { %vm45_vm0 = vcmask 261120   ;;  %s522_s1 = inlined_call_operand.vmem [shape: f32[1,32], index: 1, kind: input, shape index: {}]   ;;  %s523_s2 = inlined_call_operand.vmem [shape: f32[1,32], index: 2, kind: input, shape index: {}]   ;;  %s524_s3 = inlined_call_operand.vmem [shape: f32[32,32], index: 3, kind: input, shape index: {}]   ;;  %s525_s4 = inlined_call_operand.vmem [shape: f32[32,32], index: 4, kind: input, shape index: {}]   ;;  %s526_s0 = inlined_call_operand.vmem [shape: f32[48,32], index: 0, kind: input, shape index: {}]   ;;  %s527_s5 = inlined_call_operand.vmem [shape: f32[1,32], index: 5, kind: input, shape index: {}]   ;;  %s528_s6 = inlined_call_operand.vmem [shape: f32[1,32], index: 6, kind: input, shape index: {}]   ;;  %s529_s7 = inlined_call_operand.vmem [shape: f32[48,32], index: 7, kind: output, shape index: {0}]   ;;  %s530_s8 = inlined_call_operand.vmem [shape: f32[48,32], index: 8, kind: output, shape index: {1}]  }
   0x1   :  { %v34_v0 = vld [vmem:[%s524_s3] sm:$0xff]  ;;  %v35_v1 = vld [vmem:[%s524_s3 + $0x8] sm:$0xff]  ;;  %v36_v5 = vld [vmem:[%s524_s3 + $0x10] sm:$0xff] }
   0x2   :  { %v165_v2 = vld [vmem:[%s525_s4] sm:$0xff]  ;;  %v353_v3 = vpack.c.bf16 %v35_v1, %v34_v0  ;;  %v166_v4 = vld [vmem:[%s525_s4 + $0x8] sm:$0xff]  ;;  %v37_v6 = vld [vmem:[%s524_s3 + $0x18] sm:$0xff] }
   0x3   :  { %v361_v7 = vpack.c.bf16 %v166_v4, %v165_v2  ;;  %v357_v8 = vpack.c.bf16 %v37_v6, %v36_v5  ;;  %v167_v9 = vld [vmem:[%s525_s4 + $0x10] sm:$0xff]  ;;  %v168_v10 = vld [vmem:[%s525_s4 + $0x18] sm:$0xff]  ;;  %v28_v11 = vld [vmem:[%s526_s0] sm:$0xff] }
   0x4   :  { %354 = vmatprep.subr.bf16.mxu0 %v353_v3  ;;  %v365_v12 = vpack.c.bf16 %v168_v10, %v167_v9  ;;  %327 = vmatprep.mubr.msk.f32.mxu0 %vm45_vm0, %v28_v11  ;;  %v29_v13 = vld [vmem:[%s526_s0 + $0x8] sm:$0xff]  ;;  %v30_v14 = vld [vmem:[%s526_s0 + $0x10] sm:$0xff]  ;;  %v31_v15 = vld [vmem:[%s526_s0 + $0x18] sm:$0xff] }
   0x5   :  { %362 = vmatprep.subr.bf16.mxu1 %v361_v7  ;;  %356 = vmatpush3.bf16.msra.mxu0 %v353_v3  ;;  %v32_v16 = vld [vmem:[%s526_s0 + $0x20] sm:$0xff]  ;;  %v33_v17 = vld [vmem:[%s526_s0 + $0x28] sm:$0xff] }
   0x6   :  { %364 = vmatpush3.bf16.msra.mxu1 %v361_v7  ;;  %358 = vmatprep.subr.bf16.mxu0 %v357_v8  ;;  %v285_v18 = vld [vmem:[%s527_s5] ss:$0 sm:$0xff] }
   0x7   :  { %366 = vmatprep.subr.bf16.mxu1 %v365_v12  ;;  %344 = vmatprep.mubr.msk.f32.mxu1 %vm45_vm0, %v28_v11  ;;  %v292_v19 = vld [vmem:[%s528_s6] ss:$0 sm:$0xff] }
   0x9   :  { %360 = vmatpush3.bf16.msra.mxu0 %v357_v8 }
   0xa   :  { %368 = vmatpush3.bf16.msra.mxu1 %v365_v12 }
   0xc   :  { %328 = vmatmul.mubr.msk.f32.vlgmr.msra.gmra.mrb[0].mxu0 %vm45_vm0, %v29_v13 }
   0xd   :  { %345 = vmatmul.mubr.msk.f32.vlgmr.msra.gmra.mrb[0].mxu1 %vm45_vm0, %v29_v13  ;;  %330 = vmatprep.mubr.msk.f32.mxu0 %vm45_vm0, %v30_v14 }
   0xe   :  { %347 = vmatprep.mubr.msk.f32.mxu1 %vm45_vm0, %v30_v14 }
  0x10   :  { %331 = vmatmul.mubr.msk.f32.gmra.mrb[2].mxu0 %vm45_vm0, %v31_v15 }
  0x11   :  { %348 = vmatmul.mubr.msk.f32.gmra.mrb[2].mxu1 %vm45_vm0, %v31_v15  ;;  %333 = vmatprep.mubr.msk.f32.mxu0 %vm45_vm0, %v32_v16 }
  0x12   :  { %350 = vmatprep.mubr.msk.f32.mxu1 %vm45_vm0, %v32_v16 }
  0x14   :  { %334 = vmatmul.mubr.msk.f32.gmra.mrb[4].mxu0 %vm45_vm0, %v33_v17 }
  0x15   :  { %351 = vmatmul.mubr.msk.f32.gmra.mrb[4].mxu1 %vm45_vm0, %v33_v17 }
  0xdf   :  { %v329_v20 = vpop.f32.mrb[0].mxu0 }
  0xe0   :  { %v136_v21 = vadd.f32 %v329_v20, %v285_v18  ;;  %v346_v22 = vpop.f32.mrb[0].mxu1  ;;  %v130_v23 = vpop.f32.mrb[1].mxu0 }
  0xe1   :  { %v248_v24 = vadd.f32 %v346_v22, %v292_v19  ;;  %v131_v25 = vadd.f32 %v285_v18, %v130_v23  ;;  %v242_v26 = vpop.f32.mrb[1].mxu1 }
  0xe2   :  { %160 = vst.msk [vmem:[%s529_s7 + $0x8] sm:$0xff] %vm45_vm0, %v136_v21  ;;  %v243_v27 = vadd.f32 %v292_v19, %v242_v26 }
  0xe3   :  { %272 = vst.msk [vmem:[%s530_s8 + $0x8] sm:$0xff] %vm45_vm0, %v248_v24  ;;  %159 = vst.msk [vmem:[%s529_s7] sm:$0xff] %vm45_vm0, %v131_v25  ;;  %v332_v28 = vpop.f32.mrb[2].mxu0 }
  0xe4   :  { %271 = vst.msk [vmem:[%s530_s8] sm:$0xff] %vm45_vm0, %v243_v27  ;;  %v146_v29 = vadd.f32 %v332_v28, %v285_v18  ;;  %v349_v30 = vpop.f32.mrb[2].mxu1  ;;  %v140_v31 = vpop.f32.mrb[3].mxu0 }
  0xe5   :  { %v258_v32 = vadd.f32 %v349_v30, %v292_v19  ;;  %v141_v33 = vadd.f32 %v285_v18, %v140_v31  ;;  %v252_v34 = vpop.f32.mrb[3].mxu1 }
  0xe6   :  { %162 = vst.msk [vmem:[%s529_s7 + $0x18] sm:$0xff] %vm45_vm0, %v146_v29  ;;  %v253_v35 = vadd.f32 %v292_v19, %v252_v34 }
  0xe7   :  { %274 = vst.msk [vmem:[%s530_s8 + $0x18] sm:$0xff] %vm45_vm0, %v258_v32  ;;  %161 = vst.msk [vmem:[%s529_s7 + $0x10] sm:$0xff] %vm45_vm0, %v141_v33  ;;  %v335_v36 = vpop.f32.mrb[4].mxu0 }
  0xe8   :  { %273 = vst.msk [vmem:[%s530_s8 + $0x10] sm:$0xff] %vm45_vm0, %v253_v35  ;;  %v156_v37 = vadd.f32 %v335_v36, %v285_v18  ;;  %v352_v38 = vpop.f32.mrb[4].mxu1  ;;  %v150_v39 = vpop.f32.mrb[5].mxu0 }
  0xe9   :  { %v268_v40 = vadd.f32 %v352_v38, %v292_v19  ;;  %v151_v41 = vadd.f32 %v285_v18, %v150_v39  ;;  %v262_v42 = vpop.f32.mrb[5].mxu1 }
  0xea   :  { %164 = vst.msk [vmem:[%s529_s7 + $0x28] sm:$0xff] %vm45_vm0, %v156_v37  ;;  %v263_v43 = vadd.f32 %v292_v19, %v262_v42 }
  0xeb   :  { %276 = vst.msk [vmem:[%s530_s8 + $0x28] sm:$0xff] %vm45_vm0, %v268_v40  ;;  %163 = vst.msk [vmem:[%s529_s7 + $0x20] sm:$0xff] %vm45_vm0, %v151_v41 }
  0xec   :  { %275 = vst.msk [vmem:[%s530_s8 + $0x20] sm:$0xff] %vm45_vm0, %v263_v43 }

// kernel: sub_band_sequence_model.5
= control target key start
LH: loop header
LB: loop body
LE: loop exit
PB: predicated region body
PF: predicated region fallthrough
CT: control target
= control target key end

     0   :  { %vm34_vm0 = vcmask 130048   ;;  %vm262_vm1 = vcmask 261120   ;;  %s654_s0 = inlined_call_operand.vmem [shape: f32[48,16], index: 0, kind: input, shape index: {}]   ;;  %s655_s3 = inlined_call_operand.vmem [shape: f32[16,32], index: 3, kind: input, shape index: {}]   ;;  %s656_s4 = inlined_call_operand.vmem [shape: f32[16,32], index: 4, kind: input, shape index: {}]   ;;  %s657_s1 = inlined_call_operand.vmem [shape: f32[1,16], index: 1, kind: input, shape index: {}]   ;;  %s658_s2 = inlined_call_operand.vmem [shape: f32[1,16], index: 2, kind: input, shape index: {}]   ;;  %s659_s5 = inlined_call_operand.vmem [shape: f32[1,32], index: 5, kind: input, shape index: {}]   ;;  %s660_s6 = inlined_call_operand.vmem [shape: f32[1,32], index: 6, kind: input, shape index: {}]   ;;  %s661_s7 = inlined_call_operand.vmem [shape: f32[48,32], index: 7, kind: output, shape index: {0}]   ;;  %s662_s8 = inlined_call_operand.vmem [shape: f32[48,32], index: 8, kind: output, shape index: {1}]  }
   0x1   :  { %v28_v0 = vld [vmem:[%s654_s0] sm:$0xff]  ;;  %v30_v1 = vld [vmem:[%s654_s0 + $0x10] sm:$0xff]  ;;  %v29_v2 = vld [vmem:[%s654_s0 + $0x8] sm:$0xff] }
   0x2   :  { %v35_v3 = vsel %vm34_vm0, %v28_v0, 0.0  ;;  %v41_v4 = vsel %vm34_vm0, %v30_v1, 0.0  ;;  %v31_v5 = vld [vmem:[%s654_s0 + $0x18] sm:$0xff]  ;;  %v38_v6 = vsel %vm34_vm0, %v29_v2, 0.0  ;;  %v32_v8 = vld [vmem:[%s654_s0 + $0x20] sm:$0xff]  ;;  %v33_v9 = vld [vmem:[%s654_s0 + $0x28] sm:$0xff] }
   0x3   :  { %36 = vadd.xlane.f32.xlu0 %v35_v3  ;;  %42 = vadd.xlane.f32.xlu1 %v41_v4  ;;  %v44_v7 = vsel %vm34_vm0, %v31_v5, 0.0  ;;  %v47_v10 = vsel %vm34_vm0, %v32_v8, 0.0  ;;  %v50_v11 = vsel %vm34_vm0, %v33_v9, 0.0  ;;  %v140_v42 = vld [vmem:[%s655_s3] sm:$0xff]  ;;  %v141_v43 = vld [vmem:[%s655_s3 + $0x8] sm:$0xff] }
   0x4   :  { %v445_v44 = vpack.c.bf16 %v141_v43, %v140_v42  ;;  %v269_v45 = vld [vmem:[%s656_s4] sm:$0xff]  ;;  %v270_v46 = vld [vmem:[%s656_s4 + $0x8] sm:$0xff] }
   0x5   :  { %v449_v47 = vpack.c.bf16 %v270_v46, %v269_v45  ;;  %v387_v3 = vld [vmem:[%s657_s1] ss:$0 sm:$0xff] }
   0x6   :  { %446 = vmatprep.subr.bf16.mxu0 %v445_v44 }
   0x7   :  { %39 = vadd.xlane.f32.xlu0 %v38_v6  ;;  %45 = vadd.xlane.f32.xlu1 %v44_v7 }
   0x8   :  { %448 = vmatpush3.bf16.msra.mxu0 %v445_v44  ;;  %450 = vmatprep.subr.bf16.mxu1 %v449_v47 }
   0x9   :  { %452 = vmatpush3.bf16.msra.mxu1 %v449_v47 }
   0xb   :  { %48 = vadd.xlane.f32.xlu0 %v47_v10  ;;  %51 = vadd.xlane.f32.xlu1 %v50_v11 }
  0x90   :  { %v37_v12 = vpop.xlane.xlu0 %36  ;;  %v43_v13 = vpop.xlane.xlu1 %42 }
  0x91   :  { %v54_v14 = vmul.f32 0.0625, %v37_v12  ;;  %v56_v15 = vmul.f32 0.0625, %v43_v13 }
  0x93   :  { %v534_v16 = vsub.f32 %v28_v0, %v54_v14  ;;  %v536_v17 = vsub.f32 %v30_v1, %v56_v15 }
  0x94   :  { %v40_v18 = vpop.xlane.xlu0 %39  ;;  %v46_v19 = vpop.xlane.xlu1 %45 }
  0x95   :  { %v55_v20 = vmul.f32 0.0625, %v40_v18  ;;  %v57_v21 = vmul.f32 0.0625, %v46_v19  ;;  %v66_v22 = vmul.f32 %v534_v16, %v534_v16  ;;  %v68_v23 = vmul.f32 %v536_v17, %v536_v17 }
  0x97   :  { %v542_v24 = vsub.f32 %v29_v2, %v55_v20  ;;  %v544_v25 = vsub.f32 %v31_v5, %v57_v21  ;;  %v72_v26 = vsel %vm34_vm0, %v66_v22, 0.0  ;;  %v78_v29 = vsel %vm34_vm0, %v68_v23, 0.0  ;;  %v388_v5 = vld [vmem:[%s658_s2] ss:$0 sm:$0xff] }
  0x98   :  { %73 = vadd.xlane.f32.xlu0 %v72_v26  ;;  %v49_v27 = vpop.xlane.xlu0 %48  ;;  %v52_v28 = vpop.xlane.xlu1 %51 }
  0x99   :  { %v58_v30 = vmul.f32 0.0625, %v49_v27  ;;  %v59_v31 = vmul.f32 0.0625, %v52_v28  ;;  %v67_v32 = vmul.f32 %v542_v24, %v542_v24  ;;  %v69_v33 = vmul.f32 %v544_v25, %v544_v25  ;;  %v389_v28 = vld [vmem:[%s659_s5] ss:$0 sm:$0xff] }
  0x9b   :  { %v552_v34 = vsub.f32 %v32_v8, %v58_v30  ;;  %v554_v35 = vsub.f32 %v33_v9, %v59_v31  ;;  %v75_v36 = vsel %vm34_vm0, %v67_v32, 0.0  ;;  %v81_v37 = vsel %vm34_vm0, %v69_v33, 0.0 }
  0x9c   :  { %79 = vadd.xlane.f32.xlu0 %v78_v29  ;;  %76 = vadd.xlane.f32.xlu1 %v75_v36  ;;  %v396_v29 = vld [vmem:[%s660_s6] ss:$0 sm:$0xff] }
  0x9d   :  { %v70_v38 = vmul.f32 %v552_v34, %v552_v34  ;;  %v71_v39 = vmul.f32 %v554_v35, %v554_v35 }
  0x9f   :  { %v84_v40 = vsel %vm34_vm0, %v70_v38, 0.0  ;;  %v87_v41 = vsel %vm34_vm0, %v71_v39, 0.0 }
  0xa0   :  { %82 = vadd.xlane.f32.xlu1 %v81_v37  ;;  %85 = vadd.xlane.f32.xlu0 %v84_v40 }
  0xa4   :  { %88 = vadd.xlane.f32.xlu1 %v87_v41 }
 0x125   :  { %v74_v48 = vpop.xlane.xlu0 %73 }
 0x126   :  { %v90_v49 = vmul.f32 0.0625, %v74_v48 }
 0x128   :  { %v96_v50 = vadd.f32 1e-05, %v90_v49 }
 0x129   :  { %v77_v51 = vpop.xlane.xlu1 %76  ;;  %v80_v52 = vpop.xlane.xlu0 %79 }
 0x12a   :  { %453 = vrsqrt.f32 %v96_v50  ;;  %v91_v53 = vmul.f32 0.0625, %v77_v51  ;;  %v92_v54 = vmul.f32 0.0625, %v80_v52 }
 0x12c   :  { %v97_v55 = vadd.f32 1e-05, %v91_v53  ;;  %v98_v56 = vadd.f32 1e-05, %v92_v54 }
 0x12d   :  { %v83_v57 = vpop.xlane.xlu1 %82  ;;  %v86_v58 = vpop.xlane.xlu0 %85 }
 0x12e   :  { %455 = vrsqrt.f32 %v97_v55  ;;  %v93_v59 = vmul.f32 0.0625, %v83_v57  ;;  %v94_v60 = vmul.f32 0.0625, %v86_v58 }
 0x12f   :  { %457 = vrsqrt.f32 %v98_v56 }
 0x130   :  { %v99_v61 = vadd.f32 1e-05, %v93_v59  ;;  %v100_v62 = vadd.f32 1e-05, %v94_v60 }
 0x131   :  { %v89_v63 = vpop.xlane.xlu1 %88 }
 0x132   :  { %459 = vrsqrt.f32 %v99_v61  ;;  %v95_v0 = vmul.f32 0.0625, %v89_v63 }
 0x133   :  { %461 = vrsqrt.f32 %v100_v62 }
 0x134   :  { %v454_v1 = vpop.eup %453  ;;  %v101_v2 = vadd.f32 1e-05, %v95_v0 }
 0x135   :  { %v108_v4 = vmul.f32 %v454_v1, %v534_v16 }
 0x136   :  { %463 = vrsqrt.f32 %v101_v2 }
 0x137   :  { %v121_v6 = vmul.f32 %v387_v3, %v108_v4 }
 0x138   :  { %v456_v7 = vpop.eup %455 }
 0x139   :  { %v458_v8 = vpop.eup %457  ;;  %v134_v9 = vadd.f32 %v388_v5, %v121_v6  ;;  %v109_v10 = vmul.f32 %v456_v7, %v542_v24 }
 0x13a   :  { %v110_v11 = vmul.f32 %v458_v8, %v536_v17 }
 0x13b   :  { %423 = vmatprep.mubr.msk.f32.mxu0 %vm34_vm0, %v134_v9  ;;  %436 = vmatprep.mubr.msk.f32.mxu1 %vm34_vm0, %v134_v9  ;;  %v122_v12 = vmul.f32 %v387_v3, %v109_v10 }
 0x13c   :  { %v460_v13 = vpop.eup %459  ;;  %v123_v14 = vmul.f32 %v387_v3, %v110_v11 }
 0x13d   :  { %v462_v15 = vpop.eup %461  ;;  %v135_v16 = vadd.f32 %v388_v5, %v122_v12  ;;  %v111_v18 = vmul.f32 %v460_v13, %v544_v25 }
 0x13e   :  { %v136_v19 = vadd.f32 %v388_v5, %v123_v14  ;;  %v112_v20 = vmul.f32 %v462_v15, %v552_v34 }
 0x13f   :  { %424 = vmatmul.mubr.msk.f32.vlgmr.msra.gmra.mrb[0].mxu0 %vm34_vm0, %v135_v16  ;;  %437 = vmatmul.mubr.msk.f32.vlgmr.msra.gmra.mrb[0].mxu1 %vm34_vm0, %v135_v16  ;;  %v124_v21 = vmul.f32 %v387_v3, %v111_v18 }
 0x140   :  { %v464_v17 = vpop.eup %463  ;;  %426 = vmatprep.mubr.msk.f32.mxu0 %vm34_vm0, %v136_v19  ;;  %439 = vmatprep.mubr.msk.f32.mxu1 %vm34_vm0, %v136_v19  ;;  %v125_v22 = vmul.f32 %v387_v3, %v112_v20 }
 0x141   :  { %v137_v23 = vadd.f32 %v388_v5, %v124_v21  ;;  %v113_v24 = vmul.f32 %v464_v17, %v554_v35 }
 0x142   :  { %v138_v26 = vadd.f32 %v388_v5, %v125_v22 }
 0x143   :  { %427 = vmatmul.mubr.msk.f32.gmra.mrb[2].mxu0 %vm34_vm0, %v137_v23  ;;  %440 = vmatmul.mubr.msk.f32.gmra.mrb[2].mxu1 %vm34_vm0, %v137_v23  ;;  %v126_v25 = vmul.f32 %v387_v3, %v113_v24 }
 0x144   :  { %429 = vmatprep.mubr.msk.f32.mxu0 %vm34_vm0, %v138_v26  ;;  %442 = vmatprep.mubr.msk.f32.mxu1 %vm34_vm0, %v138_v26 }
 0x145   :  { %v139_v27 = vadd.f32 %v388_v5, %v126_v25 }
 0x147   :  { %430 = vmatmul.mubr.msk.f32.gmra.mrb[4].mxu0 %vm34_vm0, %v139_v27  ;;  %443 = vmatmul.mubr.msk.f32.gmra.mrb[4].mxu1 %vm34_vm0, %v139_v27 }
 0x212   :  { %v425_v30 = vpop.f32.mrb[0].mxu0  ;;  %v438_v31 = vpop.f32.mrb[0].mxu1 }
 0x213   :  { %v239_v32 = vadd.f32 %v425_v30, %v389_v28  ;;  %v350_v33 = vadd.f32 %v438_v31, %v396_v29  ;;  %v233_v34 = vpop.f32.mrb[1].mxu0  ;;  %v344_v35 = vpop.f32.mrb[1].mxu1 }
 0x214   :  { %v234_v36 = vadd.f32 %v389_v28, %v233_v34  ;;  %v345_v37 = vadd.f32 %v396_v29, %v344_v35 }
 0x215   :  { %264 = vst.msk [vmem:[%s661_s7 + $0x8] sm:$0xff] %vm262_vm1, %v239_v32  ;;  %374 = vst.msk [vmem:[%s662_s8 + $0x8] sm:$0xff] %vm262_vm1, %v350_v33 }
 0x216   :  { %263 = vst.msk [vmem:[%s661_s7] sm:$0xff] %vm262_vm1, %v234_v36  ;;  %373 = vst.msk [vmem:[%s662_s8] sm:$0xff] %vm262_vm1, %v345_v37  ;;  %v428_v38 = vpop.f32.mrb[2].mxu0  ;;  %v441_v39 = vpop.f32.mrb[2].mxu1 }
 0x217   :  { %v249_v40 = vadd.f32 %v428_v38, %v389_v28  ;;  %v360_v41 = vadd.f32 %v441_v39, %v396_v29  ;;  %v243_v42 = vpop.f32.mrb[3].mxu0  ;;  %v354_v43 = vpop.f32.mrb[3].mxu1 }
 0x218   :  { %v244_v44 = vadd.f32 %v389_v28, %v243_v42  ;;  %v355_v45 = vadd.f32 %v396_v29, %v354_v43 }
 0x219   :  { %266 = vst.msk [vmem:[%s661_s7 + $0x18] sm:$0xff] %vm262_vm1, %v249_v40  ;;  %376 = vst.msk [vmem:[%s662_s8 + $0x18] sm:$0xff] %vm262_vm1, %v360_v41 }
 0x21a   :  { %265 = vst.msk [vmem:[%s661_s7 + $0x10] sm:$0xff] %vm262_vm1, %v244_v44  ;;  %375 = vst.msk [vmem:[%s662_s8 + $0x10] sm:$0xff] %vm262_vm1, %v355_v45  ;;  %v431_v46 = vpop.f32.mrb[4].mxu0  ;;  %v444_v47 = vpop.f32.mrb[4].mxu1 }
 0x21b   :  { %v259_v48 = vadd.f32 %v431_v46, %v389_v28  ;;  %v370_v49 = vadd.f32 %v444_v47, %v396_v29  ;;  %v253_v50 = vpop.f32.mrb[5].mxu0  ;;  %v364_v51 = vpop.f32.mrb[5].mxu1 }
 0x21c   :  { %v254_v52 = vadd.f32 %v389_v28, %v253_v50  ;;  %v365_v53 = vadd.f32 %v396_v29, %v364_v51 }
 0x21d   :  { %268 = vst.msk [vmem:[%s661_s7 + $0x28] sm:$0xff] %vm262_vm1, %v259_v48  ;;  %378 = vst.msk [vmem:[%s662_s8 + $0x28] sm:$0xff] %vm262_vm1, %v370_v49 }
 0x21e   :  { %267 = vst.msk [vmem:[%s661_s7 + $0x20] sm:$0xff] %vm262_vm1, %v254_v52  ;;  %377 = vst.msk [vmem:[%s662_s8 + $0x20] sm:$0xff] %vm262_vm1, %v365_v53 }

// kernel: sub_band_sequence_model.6
= control target key start
LH: loop header
LB: loop body
LE: loop exit
PB: predicated region body
PF: predicated region fallthrough
CT: control target
= control target key end

     0   :  { %vm21_vm0 = vcmask 259072   ;;  %v1791_v0 = vmov 0.0|0.0   ;;  %vm1792_vm1 = vmmov 0   ;;  %v1793_v4 = vmov 0.0   ;;  %s2057_s2 = inlined_call_operand.vmem [shape: f32[32,32], index: 2, kind: input, shape index: {}]   ;;  %s2058_s3 = inlined_call_operand.vmem [shape: f32[32,32], index: 3, kind: input, shape index: {}]   ;;  %s2059_s0 = inlined_call_operand.vmem [shape: f32[8,6,32], index: 0, kind: input, shape index: {}]   ;;  %s2060_s1 = inlined_call_operand.vmem [shape: f32[8,6,32], index: 1, kind: input, shape index: {}]   ;;  %s2061_s4 = inlined_call_operand.vmem [shape: f32[8,6,32], index: 4, kind: output, shape index: {}]  }
   0x1   :  { %1660 = vmatprep.subr.bf16.mxu0 %v1791_v0  ;;  %v24_v1 = vld [vmem:[%s2057_s2] sm:$0xff]  ;;  %v25_v2 = vld [vmem:[%s2057_s2 + $0x8] sm:$0xff]  ;;  %v26_v3 = vld [vmem:[%s2057_s2 + $0x10] sm:$0xff]  ;;  %1492 = vmatprep.mubr.msk.f32.mxu0 %vm1792_vm1, %v1793_v4  ;;  %22 = vst.msk [vmem:[#allocation2] sm:$0x3f] %vm21_vm0, %v1793_v4  ;;  %vm35_vm2 = vcmask 261120  }
   0x2   :  { %23 = vst.msk [vmem:[#allocation3] sm:$0x3f] %vm21_vm0, %v1793_v4  ;;  %v1835_v5 = vpack.c.bf16 %v25_v2, %v24_v1  ;;  %v27_v6 = vld [vmem:[%s2057_s2 + $0x18] sm:$0xff]  ;;  %1666 = vmatprep.subr.bf16.mxu1 %v1791_v0  ;;  %v28_v7 = vld [vmem:[%s2058_s3] sm:$0xff]  ;;  %v29_v8 = vld [vmem:[%s2058_s3 + $0x8] sm:$0xff]  ;;  %1503 = vmatprep.mubr.msk.f32.mxu1 %vm1792_vm1, %v1793_v4 }
   0x3   :  { %v1849_v9 = vpack.c.bf16 %v29_v8, %v28_v7  ;;  %v30_v10 = vld [vmem:[%s2058_s3 + $0x10] sm:$0xff]  ;;  %v31_v11 = vld [vmem:[%s2058_s3 + $0x18] sm:$0xff]  ;;  %v1858_v12 = vpack.c.bf16 %v27_v6, %v26_v3  ;;  %v34_v15 = vld [vmem:[%s2059_s0] sm:$0x3f] }
   0x4   :  { %1662 = vmatpush3.bf16.msra.mxu0 %v1835_v5  ;;  %v1862_v13 = vpack.c.bf16 %v31_v11, %v30_v10  ;;  %v110_v24 = vld [vmem:[%s2060_s1] sm:$0x3f]  ;;  %v1355_v33 = vld [vmem:[%s2059_s0 + $0x8] sm:$0x3f]  ;;  %v1362_v50 = vld [vmem:[%s2059_s0 + $0x10] sm:$0x3f] }
   0x5   :  { %1663 = vmatprep.subr.bf16.mxu0 %v1791_v0  ;;  %1668 = vmatpush3.bf16.msra.mxu1 %v1849_v9  ;;  %v1357_v42 = vld [vmem:[%s2060_s1 + $0x8] sm:$0x3f]  ;;  %v1364_v59 = vld [vmem:[%s2060_s1 + $0x10] sm:$0x3f]  ;;  %v1369_v6 = vld [vmem:[%s2059_s0 + $0x18] sm:$0x3f] }
   0x6   :  { %1669 = vmatprep.subr.bf16.mxu1 %v1791_v0 }
   0x8   :  { %1665 = vmatpush3.bf16.msra.mxu0 %v1858_v12  ;;  %v32_v14 = vld [vmem:[#allocation2] sm:$0x3f] }
   0x9   :  { %1671 = vmatpush3.bf16.msra.mxu1 %v1862_v13  ;;  %1672 = vmatprep.subr.bf16.mxu0 %v1791_v0  ;;  %v33_v27 = vld [vmem:[#allocation3] sm:$0x3f] }
   0xa   :  { %1678 = vmatprep.subr.bf16.mxu1 %v1791_v0 }
   0xb   :  { %1493 = vmatmul.mubr.msk.f32.vlgmr.msra.gmra.mrb[0].mxu0 %vm35_vm2, %v32_v14 }
   0xc   :  { %1504 = vmatmul.mubr.msk.f32.vlgmr.msra.gmra.mrb[0].mxu1 %vm35_vm2, %v32_v14  ;;  %1674 = vmatpush3.bf16.msra.mxu0 %v1835_v5 }
   0xd   :  { %1680 = vmatpush3.bf16.msra.mxu1 %v1849_v9  ;;  %1675 = vmatprep.subr.bf16.mxu0 %v1791_v0 }
   0xe   :  { %1681 = vmatprep.subr.bf16.mxu1 %v1791_v0  ;;  %1514 = vmatprep.mubr.msk.f32.mxu0 %vm1792_vm1, %v1793_v4 }
   0xf   :  { %1525 = vmatprep.mubr.msk.f32.mxu1 %vm1792_vm1, %v1793_v4 }
  0x10   :  { %1677 = vmatpush3.bf16.msra.mxu0 %v1858_v12 }
  0x11   :  { %1683 = vmatpush3.bf16.msra.mxu1 %v1862_v13  ;;  %1684 = vmatprep.subr.bf16.mxu0 %v1791_v0 }
  0x12   :  { %1690 = vmatprep.subr.bf16.mxu1 %v1791_v0 }
  0xde   :  { %v105_v16 = vpop.f32.mrb[0].mxu0 }
  0xdf   :  { %v109_v17 = vadd.f32 %v105_v16, %v34_v15  ;;  %v1494_v18 = vpop.f32.mrb[1].mxu0  ;;  %v177_v19 = vpop.f32.mrb[0].mxu1 }
  0xe0   :  { %v1505_v20 = vpop.f32.mrb[1].mxu1  ;;  %v181_v25 = vadd.f32 %v177_v19, %v110_v24  ;;  %v1371_v18 = vld [vmem:[%s2060_s1 + $0x18] sm:$0x3f] }
  0xe1   :  { %v1353_v21 = vmul.f32 -1.442695, %v109_v17 }
  0xe3   :  { %1759 = vpow2.f32 %v1353_v21 }
  0xed   :  { %v1760_v22 = vpop.eup %1759 }
  0xee   :  { %v185_v23 = vadd.f32 1.0, %v1760_v22 }
  0xf0   :  { %1761 = vrcp.f32 %v185_v23 }
  0xfa   :  { %v1762_v26 = vpop.eup %1761 }
  0xfb   :  { %v189_v28 = vsub.f32 1.0, %v1762_v26  ;;  %v188_v29 = vmul.f32 %v1762_v26, %v33_v27  ;;  %v1376_v26 = vld [vmem:[%s2059_s0 + $0x20] sm:$0x3f] }
  0xfd   :  { %v190_v30 = vmul.f32 %v189_v28, %v181_v25 }
  0xff   :  { %v191_v31 = vadd.f32 %v190_v30, %v188_v29 }
 0x101   :  { %vm192_vm3 = vcmp.gt.f32.partialorder %v191_v31, 0.5 }
 0x102   :  { %v1354_v32 = vsel %vm192_vm3, 1.0, %v1793_v4 }
 0x103   :  { %196 = vst.msk [vmem:[%s2061_s4] sm:$0x3f] %vm21_vm0, %v1354_v32  ;;  %1515 = vmatmul.mubr.msk.f32.vlgmr.msra.gmra.mrb[2].mxu0 %vm35_vm2, %v1354_v32  ;;  %1526 = vmatmul.mubr.msk.f32.vlgmr.msra.gmra.mrb[2].mxu1 %vm35_vm2, %v1354_v32 }
 0x104   :  { %1686 = vmatpush3.bf16.msra.mxu0 %v1835_v5  ;;  %1692 = vmatpush3.bf16.msra.mxu1 %v1849_v9 }
 0x105   :  { %1687 = vmatprep.subr.bf16.mxu0 %v1791_v0  ;;  %1693 = vmatprep.subr.bf16.mxu1 %v1791_v0 }
 0x106   :  { %1536 = vmatprep.mubr.msk.f32.mxu0 %vm1792_vm1, %v1793_v4  ;;  %1547 = vmatprep.mubr.msk.f32.mxu1 %vm1792_vm1, %v1793_v4 }
 0x108   :  { %1689 = vmatpush3.bf16.msra.mxu0 %v1858_v12  ;;  %1695 = vmatpush3.bf16.msra.mxu1 %v1862_v13 }
 0x109   :  { %1696 = vmatprep.subr.bf16.mxu0 %v1791_v0  ;;  %1702 = vmatprep.subr.bf16.mxu1 %v1791_v0 }
 0x1d6   :  { %v268_v34 = vpop.f32.mrb[2].mxu0  ;;  %v341_v35 = vpop.f32.mrb[2].mxu1 }
 0x1d7   :  { %v272_v36 = vadd.f32 %v1355_v33, %v268_v34  ;;  %v1516_v37 = vpop.f32.mrb[3].mxu0  ;;  %v1527_v38 = vpop.f32.mrb[3].mxu1  ;;  %v345_v44 = vadd.f32 %v1357_v42, %v341_v35  ;;  %v1378_v35 = vld [vmem:[%s2060_s1 + $0x20] sm:$0x3f] }
 0x1d9   :  { %v1359_v39 = vmul.f32 -1.442695, %v272_v36 }
 0x1db   :  { %1763 = vpow2.f32 %v1359_v39 }
 0x1e5   :  { %v1764_v40 = vpop.eup %1763 }
 0x1e6   :  { %v349_v41 = vadd.f32 1.0, %v1764_v40 }
 0x1e8   :  { %1765 = vrcp.f32 %v349_v41 }
 0x1f2   :  { %v1766_v43 = vpop.eup %1765 }
 0x1f3   :  { %v353_v45 = vsub.f32 1.0, %v1766_v43  ;;  %v352_v46 = vmul.f32 %v1766_v43, %v191_v31  ;;  %v1383_v43 = vld [vmem:[%s2059_s0 + $0x28] sm:$0x3f] }
 0x1f5   :  { %v354_v47 = vmul.f32 %v353_v45, %v345_v44 }
 0x1f7   :  { %v355_v48 = vadd.f32 %v354_v47, %v352_v46 }
 0x1f9   :  { %vm356_vm4 = vcmp.gt.f32.partialorder %v355_v48, 0.5 }
 0x1fa   :  { %v1360_v49 = vsel %vm356_vm4, 1.0, %v1793_v4 }
 0x1fb   :  { %1361 = vst.msk [vmem:[%s2061_s4 + $0x8] sm:$0x3f] %vm21_vm0, %v1360_v49  ;;  %1537 = vmatmul.mubr.msk.f32.vlgmr.msra.gmra.mrb[4].mxu0 %vm35_vm2, %v1360_v49  ;;  %1548 = vmatmul.mubr.msk.f32.vlgmr.msra.gmra.mrb[4].mxu1 %vm35_vm2, %v1360_v49 }
 0x1fc   :  { %1698 = vmatpush3.bf16.msra.mxu0 %v1835_v5  ;;  %1704 = vmatpush3.bf16.msra.mxu1 %v1849_v9 }
 0x1fd   :  { %1699 = vmatprep.subr.bf16.mxu0 %v1791_v0  ;;  %1705 = vmatprep.subr.bf16.mxu1 %v1791_v0 }
 0x1fe   :  { %1558 = vmatprep.mubr.msk.f32.mxu0 %vm1792_vm1, %v1793_v4  ;;  %1569 = vmatprep.mubr.msk.f32.mxu1 %vm1792_vm1, %v1793_v4 }
 0x200   :  { %1701 = vmatpush3.bf16.msra.mxu0 %v1858_v12  ;;  %1707 = vmatpush3.bf16.msra.mxu1 %v1862_v13 }
 0x201   :  { %1708 = vmatprep.subr.bf16.mxu0 %v1791_v0  ;;  %1714 = vmatprep.subr.bf16.mxu1 %v1791_v0 }
 0x2ce   :  { %v432_v51 = vpop.f32.mrb[4].mxu0  ;;  %v505_v52 = vpop.f32.mrb[4].mxu1 }
 0x2cf   :  { %v436_v53 = vadd.f32 %v1362_v50, %v432_v51  ;;  %v1538_v54 = vpop.f32.mrb[5].mxu0  ;;  %v1549_v55 = vpop.f32.mrb[5].mxu1  ;;  %v509_v61 = vadd.f32 %v1364_v59, %v505_v52  ;;  %v1385_v52 = vld [vmem:[%s2060_s1 + $0x28] sm:$0x3f] }
 0x2d1   :  { %v1366_v56 = vmul.f32 -1.442695, %v436_v53 }
 0x2d3   :  { %1767 = vpow2.f32 %v1366_v56 }
 0x2dd   :  { %v1768_v57 = vpop.eup %1767 }
 0x2de   :  { %v513_v58 = vadd.f32 1.0, %v1768_v57 }
 0x2e0   :  { %1769 = vrcp.f32 %v513_v58 }
 0x2ea   :  { %v1770_v60 = vpop.eup %1769 }
 0x2eb   :  { %v517_v62 = vsub.f32 1.0, %v1770_v60  ;;  %v516_v63 = vmul.f32 %v1770_v60, %v355_v48 }
 0x2ed   :  { %v518_v1 = vmul.f32 %v517_v62, %v509_v61 }
 0x2ef   :  { %v519_v2 = vadd.f32 %v518_v1, %v516_v63 }
 0x2f1   :  { %vm520_vm5 = vcmp.gt.f32.partialorder %v519_v2, 0.5 }
 0x2f2   :  { %v1367_v3 = vsel %vm520_vm5, 1.0, %v1793_v4 }
 0x2f3   :  { %1368 = vst.msk [vmem:[%s2061_s4 + $0x10] sm:$0x3f] %vm21_vm0, %v1367_v3  ;;  %1559 = vmatmul.mubr.msk.f32.vlgmr.msra.gmra.mrb[6].mxu0 %vm35_vm2, %v1367_v3  ;;  %1570 = vmatmul.mubr.msk.f32.vlgmr.msra.gmra.mrb[6].mxu1 %vm35_vm2, %v1367_v3 }
 0x2f4   :  { %1710 = vmatpush3.bf16.msra.mxu0 %v1835_v5  ;;  %1716 = vmatpush3.bf16.msra.mxu1 %v1849_v9 }
 0x2f5   :  { %1711 = vmatprep.subr.bf16.mxu0 %v1791_v0  ;;  %1717 = vmatprep.subr.bf16.mxu1 %v1791_v0 }
 0x2f6   :  { %1580 = vmatprep.mubr.msk.f32.mxu0 %vm1792_vm1, %v1793_v4  ;;  %1591 = vmatprep.mubr.msk.f32.mxu1 %vm1792_vm1, %v1793_v4 }
 0x2f8   :  { %1713 = vmatpush3.bf16.msra.mxu0 %v1858_v12  ;;  %1719 = vmatpush3.bf16.msra.mxu1 %v1862_v13 }
 0x2f9   :  { %1720 = vmatprep.subr.bf16.mxu0 %v1791_v0  ;;  %1726 = vmatprep.subr.bf16.mxu1 %v1791_v0 }
 0x3c6   :  { %v596_v7 = vpop.f32.mrb[6].mxu0  ;;  %v669_v8 = vpop.f32.mrb[6].mxu1 }
 0x3c7   :  { %v600_v10 = vadd.f32 %v1369_v6, %v596_v7  ;;  %v1560_v11 = vpop.f32.mrb[7].mxu0  ;;  %v1571_v14 = vpop.f32.mrb[7].mxu1  ;;  %v673_v20 = vadd.f32 %v1371_v18, %v669_v8 }
 0x3c8   :  { %v1397_v14 = vld [vmem:[%s2059_s0 + $0x38] sm:$0x3f] }
 0x3c9   :  { %v1373_v15 = vmul.f32 -1.442695, %v600_v10 }
 0x3cb   :  { %1771 = vpow2.f32 %v1373_v15 }
 0x3d5   :  { %v1772_v16 = vpop.eup %1771 }
 0x3d6   :  { %v677_v17 = vadd.f32 1.0, %v1772_v16 }
 0x3d8   :  { %1773 = vrcp.f32 %v677_v17 }
 0x3e2   :  { %v1774_v19 = vpop.eup %1773 }
 0x3e3   :  { %v681_v21 = vsub.f32 1.0, %v1774_v19  ;;  %v680_v22 = vmul.f32 %v1774_v19, %v519_v2 }
 0x3e5   :  { %v682_v23 = vmul.f32 %v681_v21, %v673_v20 }
 0x3e7   :  { %v683_v24 = vadd.f32 %v682_v23, %v680_v22  ;;  %v1399_v23 = vld [vmem:[%s2060_s1 + $0x38] sm:$0x3f] }
 0x3e9   :  { %vm684_vm6 = vcmp.gt.f32.partialorder %v683_v24, 0.5 }
 0x3ea   :  { %v1374_v25 = vsel %vm684_vm6, 1.0, %v1793_v4 }
 0x3eb   :  { %1375 = vst.msk [vmem:[%s2061_s4 + $0x18] sm:$0x3f] %vm21_vm0, %v1374_v25  ;;  %1581 = vmatmul.mubr.msk.f32.vlgmr.msra.gmra.mrb[8].mxu0 %vm35_vm2, %v1374_v25  ;;  %1592 = vmatmul.mubr.msk.f32.vlgmr.msra.gmra.mrb[8].mxu1 %vm35_vm2, %v1374_v25 }
 0x3ec   :  { %1722 = vmatpush3.bf16.msra.mxu0 %v1835_v5  ;;  %1728 = vmatpush3.bf16.msra.mxu1 %v1849_v9 }
 0x3ed   :  { %1723 = vmatprep.subr.bf16.mxu0 %v1791_v0  ;;  %1729 = vmatprep.subr.bf16.mxu1 %v1791_v0 }
 0x3ee   :  { %1602 = vmatprep.mubr.msk.f32.mxu0 %vm1792_vm1, %v1793_v4  ;;  %1613 = vmatprep.mubr.msk.f32.mxu1 %vm1792_vm1, %v1793_v4 }
 0x3f0   :  { %1725 = vmatpush3.bf16.msra.mxu0 %v1858_v12  ;;  %1731 = vmatpush3.bf16.msra.mxu1 %v1862_v13 }
 0x3f1   :  { %1732 = vmatprep.subr.bf16.mxu0 %v1791_v0  ;;  %1738 = vmatprep.subr.bf16.mxu1 %v1791_v0 }
 0x4be   :  { %v760_v27 = vpop.f32.mrb[8].mxu0  ;;  %v833_v28 = vpop.f32.mrb[8].mxu1 }
 0x4bf   :  { %v764_v29 = vadd.f32 %v1376_v26, %v760_v27  ;;  %v1582_v30 = vpop.f32.mrb[9].mxu0  ;;  %v1593_v31 = vpop.f32.mrb[9].mxu1  ;;  %v837_v37 = vadd.f32 %v1378_v35, %v833_v28 }
 0x4c1   :  { %v1380_v32 = vmul.f32 -1.442695, %v764_v29 }
 0x4c3   :  { %1775 = vpow2.f32 %v1380_v32 }
 0x4cd   :  { %v1776_v33 = vpop.eup %1775 }
 0x4ce   :  { %v841_v34 = vadd.f32 1.0, %v1776_v33 }
 0x4d0   :  { %1777 = vrcp.f32 %v841_v34 }
 0x4da   :  { %v1778_v36 = vpop.eup %1777 }
 0x4db   :  { %v845_v38 = vsub.f32 1.0, %v1778_v36  ;;  %v844_v39 = vmul.f32 %v1778_v36, %v683_v24 }
 0x4dd   :  { %v846_v40 = vmul.f32 %v845_v38, %v837_v37 }
 0x4df   :  { %v847_v41 = vadd.f32 %v846_v40, %v844_v39 }
 0x4e1   :  { %vm848_vm7 = vcmp.gt.f32.partialorder %v847_v41, 0.5 }
 0x4e2   :  { %v1381_v42 = vsel %vm848_vm7, 1.0, %v1793_v4 }
 0x4e3   :  { %1382 = vst.msk [vmem:[%s2061_s4 + $0x20] sm:$0x3f] %vm21_vm0, %v1381_v42  ;;  %1603 = vmatmul.mubr.msk.f32.vlgmr.msra.gmra.mrb[10].mxu0 %vm35_vm2, %v1381_v42  ;;  %1614 = vmatmul.mubr.msk.f32.vlgmr.msra.gmra.mrb[10].mxu1 %vm35_vm2, %v1381_v42 }
 0x4e4   :  { %1734 = vmatpush3.bf16.msra.mxu0 %v1835_v5  ;;  %1740 = vmatpush3.bf16.msra.mxu1 %v1849_v9 }
 0x4e5   :  { %1735 = vmatprep.subr.bf16.mxu0 %v1791_v0  ;;  %1741 = vmatprep.subr.bf16.mxu1 %v1791_v0 }
 0x4e6   :  { %1624 = vmatprep.mubr.msk.f32.mxu0 %vm1792_vm1, %v1793_v4  ;;  %1635 = vmatprep.mubr.msk.f32.mxu1 %vm1792_vm1, %v1793_v4 }
 0x4e8   :  { %1737 = vmatpush3.bf16.msra.mxu0 %v1858_v12  ;;  %1743 = vmatpush3.bf16.msra.mxu1 %v1862_v13 }
 0x4e9   :  { %1744 = vmatprep.subr.bf16.mxu0 %v1791_v0  ;;  %1750 = vmatprep.subr.bf16.mxu1 %v1791_v0 }
 0x5b6   :  { %v924_v44 = vpop.f32.mrb[10].mxu0  ;;  %v997_v45 = vpop.f32.mrb[10].mxu1 }
 0x5b7   :  { %v928_v46 = vadd.f32 %v1383_v43, %v924_v44  ;;  %v1604_v47 = vpop.f32.mrb[11].mxu0  ;;  %v1615_v48 = vpop.f32.mrb[11].mxu1  ;;  %v1001_v54 = vadd.f32 %v1385_v52, %v997_v45 }
 0x5b9   :  { %v1387_v49 = vmul.f32 -1.442695, %v928_v46 }
 0x5bb   :  { %1779 = vpow2.f32 %v1387_v49 }
 0x5c5   :  { %v1780_v50 = vpop.eup %1779 }
 0x5c6   :  { %v1005_v51 = vadd.f32 1.0, %v1780_v50 }
 0x5c8   :  { %1781 = vrcp.f32 %v1005_v51 }
 0x5d2   :  { %v1782_v53 = vpop.eup %1781 }
 0x5d3   :  { %v1009_v55 = vsub.f32 1.0, %v1782_v53  ;;  %v1008_v56 = vmul.f32 %v1782_v53, %v847_v41 }
 0x5d5   :  { %v1010_v57 = vmul.f32 %v1009_v55, %v1001_v54 }
 0x5d7   :  { %v1011_v58 = vadd.f32 %v1010_v57, %v1008_v56 }
 0x5d9   :  { %vm1012_vm8 = vcmp.gt.f32.partialorder %v1011_v58, 0.5 }
 0x5da   :  { %v1388_v59 = vsel %vm1012_vm8, 1.0, %v1793_v4 }
 0x5db   :  { %1389 = vst.msk [vmem:[%s2061_s4 + $0x28] sm:$0x3f] %vm21_vm0, %v1388_v59  ;;  %1625 = vmatmul.mubr.msk.f32.vlgmr.msra.gmra.mrb[12].mxu0 %vm35_vm2, %v1388_v59  ;;  %1636 = vmatmul.mubr.msk.f32.vlgmr.msra.gmra.mrb[12].mxu1 %vm35_vm2, %v1388_v59 }
 0x5dc   :  { %1746 = vmatpush3.bf16.msra.mxu0 %v1835_v5  ;;  %1752 = vmatpush3.bf16.msra.mxu1 %v1849_v9  ;;  %v1390_v5 = vld [vmem:[%s2059_s0 + $0x30] sm:$0x3f] }
 0x5dd   :  { %1747 = vmatprep.subr.bf16.mxu0 %v1791_v0  ;;  %1753 = vmatprep.subr.bf16.mxu1 %v1791_v0 }
 0x5de   :  { %1646 = vmatprep.mubr.msk.f32.mxu0 %vm1792_vm1, %v1793_v4  ;;  %1657 = vmatprep.mubr.msk.f32.mxu1 %vm1792_vm1, %v1793_v4 }
 0x5e0   :  { %1749 = vmatpush3.bf16.msra.mxu0 %v1858_v12  ;;  %1755 = vmatpush3.bf16.msra.mxu1 %v1862_v13  ;;  %v1392_v12 = vld [vmem:[%s2060_s1 + $0x30] sm:$0x3f] }
 0x6ae   :  { %v1088_v60 = vpop.f32.mrb[12].mxu0  ;;  %v1161_v9 = vpop.f32.mrb[12].mxu1 }
 0x6af   :  { %v1092_v61 = vadd.f32 %v1390_v5, %v1088_v60  ;;  %v1626_v62 = vpop.f32.mrb[13].mxu0  ;;  %v1637_v63 = vpop.f32.mrb[13].mxu1  ;;  %v1165_v13 = vadd.f32 %v1392_v12, %v1161_v9 }
 0x6b1   :  { %v1394_v0 = vmul.f32 -1.442695, %v1092_v61 }
 0x6b3   :  { %1783 = vpow2.f32 %v1394_v0 }
 0x6bd   :  { %v1784_v1 = vpop.eup %1783 }
 0x6be   :  { %v1169_v2 = vadd.f32 1.0, %v1784_v1 }
 0x6c0   :  { %1785 = vrcp.f32 %v1169_v2 }
 0x6ca   :  { %v1786_v3 = vpop.eup %1785 }
 0x6cb   :  { %v1173_v6 = vsub.f32 1.0, %v1786_v3  ;;  %v1172_v7 = vmul.f32 %v1786_v3, %v1011_v58 }
 0x6cd   :  { %v1174_v8 = vmul.f32 %v1173_v6, %v1165_v13 }
 0x6cf   :  { %v1175_v10 = vadd.f32 %v1174_v8, %v1172_v7 }
 0x6d1   :  { %vm1176_vm9 = vcmp.gt.f32.partialorder %v1175_v10, 0.5 }
 0x6d2   :  { %v1395_v11 = vsel %vm1176_vm9, 1.0, %v1793_v4 }
 0x6d3   :  { %1396 = vst.msk [vmem:[%s2061_s4 + $0x30] sm:$0x3f] %vm21_vm0, %v1395_v11  ;;  %1647 = vmatmul.mubr.msk.f32.vlgmr.msra.gmra.mrb[14].mxu0 %vm35_vm2, %v1395_v11  ;;  %1658 = vmatmul.mubr.msk.f32.vlgmr.msra.gmra.mrb[14].mxu1 %vm35_vm2, %v1395_v11 }
 0x7a6   :  { %v1252_v15 = vpop.f32.mrb[14].mxu0  ;;  %v1325_v16 = vpop.f32.mrb[14].mxu1 }
 0x7a7   :  { %v1256_v17 = vadd.f32 %v1397_v14, %v1252_v15  ;;  %v1648_v18 = vpop.f32.mrb[15].mxu0  ;;  %v1659_v19 = vpop.f32.mrb[15].mxu1  ;;  %v1329_v25 = vadd.f32 %v1399_v23, %v1325_v16 }
 0x7a9   :  { %v1401_v20 = vmul.f32 -1.442695, %v1256_v17 }
 0x7ab   :  { %1787 = vpow2.f32 %v1401_v20 }
 0x7b5   :  { %v1788_v21 = vpop.eup %1787 }
 0x7b6   :  { %v1333_v22 = vadd.f32 1.0, %v1788_v21 }
 0x7b8   :  { %1789 = vrcp.f32 %v1333_v22 }
 0x7c2   :  { %v1790_v24 = vpop.eup %1789 }
 0x7c3   :  { %v1337_v26 = vsub.f32 1.0, %v1790_v24  ;;  %v1336_v27 = vmul.f32 %v1790_v24, %v1175_v10 }
 0x7c5   :  { %v1338_v28 = vmul.f32 %v1337_v26, %v1329_v25 }
 0x7c7   :  { %v1339_v29 = vadd.f32 %v1338_v28, %v1336_v27 }
 0x7c9   :  { %vm1340_vm10 = vcmp.gt.f32.partialorder %v1339_v29, 0.5  ;;  %1346 = vst.msk [vmem:[#allocation3] sm:$0x3f] %vm21_vm0, %v1339_v29 }
 0x7ca   :  { %v1402_v30 = vsel %vm1340_vm10, 1.0, %v1793_v4 }
 0x7cb   :  { %1403 = vst.msk [vmem:[%s2061_s4 + $0x38] sm:$0x3f] %vm21_vm0, %v1402_v30  ;;  %1345 = vst.msk [vmem:[#allocation2] sm:$0x3f] %vm21_vm0, %v1402_v30 }

</bundles_post_ra>
